<compile_context>
chip_gen: v6e
topology: v6e:2x2x1
jax: 0.10.0
libtpu: 0.0.40
codegen_flags: <defaults>
</compile_context>

<pallas_src>
import functools

import numpy as np
import jax
import jax.numpy as jnp
from jax import lax
from jax.experimental import pallas as pl
from jax.experimental.pallas import tpu as pltpu

_SENTINEL = -12345.0   # label for padded rows/cols (never equals a real class id)
_NEG_BIG = 1e9         # additive bias: exp(logit - row_max) of padded cols -> 0
_TINY = 1e-37          # clamp for log() so padded / degenerate rows stay finite
_LANE = 128


# ----------------------------------------------------------------------------
# Pallas kernel: one row tile of the supervised-contrastive loss
# ----------------------------------------------------------------------------
def _contrastive_tile_kernel(f_ref, rmeta_ref, cmeta_ref, out_ref, *,
                             tm, temperature, base_temperature):
    inv_t = jnp.float32(1.0 / temperature)

    # Row tile sliced out of the VMEM-resident full feature matrix: the same
    # HBM array is DMA'd exactly once for the whole kernel.
    row0 = pl.multiple_of(pl.program_id(0) * tm, tm)
    f_full = f_ref[...]                            # (Np, D) bf16, resident
    f_tile = f_ref[pl.ds(row0, tm), :]             # (TM, D) bf16

    # Gram tile on the MXU: bf16 operands, f32 accumulation.
    s = lax.dot_general(f_tile, f_full, (((1,), (1,)), ((), ())),
                        preferred_element_type=jnp.float32) * inv_t   # (TM, Np)

    lab_col = cmeta_ref[0:1, :]                    # (1, Np)  labels of columns
    col_bias = cmeta_ref[1:2, :]                   # (1, Np)  0 valid / -BIG padded
    lab_row = rmeta_ref[pl.ds(row0, tm), 0:1]      # (TM, 1)  labels of rows
    val_row = rmeta_ref[pl.ds(row0, tm), 1:2]      # (TM, 1)  1 valid / 0 padded

    # Padded columns -> -BIG so their exp() flushes to exactly 0.
    s = s + col_bias

    row_max = jnp.max(s, axis=1, keepdims=True)    # >= diag >= 0 for every row
    logits = s - row_max
    exp_l = jnp.exp(logits)

    eq = lab_row == lab_col                        # bool (TM, Np), fused via where()

    sum_exp = jnp.sum(exp_l, axis=1, keepdims=True)
    sum_exp_pos = jnp.sum(jnp.where(eq, exp_l, 0.0), axis=1, keepdims=True)
    neg_sum = sum_exp - sum_exp_pos                # negatives only (diag has eq=True)

    log_prob = logits - jnp.log(jnp.maximum(exp_l + neg_sum, jnp.float32(_TINY)))
    pos_lp = jnp.sum(jnp.where(eq, log_prob, 0.0), axis=1, keepdims=True)
    pos_cnt = jnp.sum(jnp.where(eq, 1.0, 0.0), axis=1, keepdims=True) - 1.0

    # Self-similarity handled analytically: diag(s) = ||f_i||^2 / T, subtracted
    # from the positive row-sums (no iota-based not_diag masks materialized).
    f32 = f_tile.astype(jnp.float32)
    diag_s = jnp.sum(f32 * f32, axis=1, keepdims=True) * inv_t         # (TM, 1)
    diag_logit = diag_s - row_max
    diag_lp = diag_logit - jnp.log(
        jnp.maximum(jnp.exp(diag_logit) + neg_sum, jnp.float32(_TINY)))
    pos_lp = pos_lp - diag_lp

    # NOTE: rows with zero positives contribute 0; the PyTorch reference
    # divides by 0 and produces NaN in that degenerate case.
    mean_lp = pos_lp / jnp.maximum(pos_cnt, 1.0)
    per_row = jnp.float32(-(temperature / base_temperature)) * mean_lp  # (TM, 1)

    num = jnp.sum(per_row * val_row, axis=0, keepdims=True)             # (1, 1)
    den = jnp.sum(val_row, axis=0, keepdims=True)                       # (1, 1)
    # Partial writes: only sublane 0 (num) and sublane 1 (den) of the block.
    out_ref[0, 0:1, :] = jnp.broadcast_to(num, (1, _LANE))
    out_ref[0, 1:2, :] = jnp.broadcast_to(den, (1, _LANE))


# ----------------------------------------------------------------------------
# Device wrapper
# ----------------------------------------------------------------------------
def _round_up(x, m):
    return ((x + m - 1) // m) * m


@functools.lru_cache(maxsize=None)
def _vmem_capacity_bytes():
    try:
        return int(pltpu.get_tpu_info().vmem_capacity_bytes)
    except Exception:
        return 64 << 20            # conservative default: v7x per-TensorCore VMEM


def _pick_tile_and_vmem(n_pad, d_pad):
    """Pick the row-tile size and scoped-VMEM limit from the chip's capacity."""
    cap = _vmem_capacity_bytes()
    lane_d = max(d_pad, _LANE)                 # VMEM lane-pads the last dim to 128
    resident = (n_pad * lane_d * 2             # f (bf16, single resident copy)
                + 8 * n_pad * 4                # cmeta (8, Np) f32
                + n_pad * _LANE * 4)           # rmeta (Np, 8) f32, lane-padded

    def tile_bytes(tm):                        # live f32 temporaries of one row tile
        return 7 * tm * n_pad * 4 + tm * lane_d * 4

    budget = int(cap * 0.6)
    tm = 128
    # 256-row tiles only if they fit the budget and still leave >=2 grid steps
    # (so the "parallel" grid axis can be sharded across TensorCores on v7x).
    if n_pad % 256 == 0 and n_pad >= 512 and resident + tile_bytes(256) <= budget:
        tm = 256
    vmem_limit = int(min(cap * 0.8,
                         max(32 << 20, resident + tile_bytes(tm) + (8 << 20))))
    return tm, vmem_limit


@functools.partial(jax.jit, static_argnames=("temperature", "base_temperature"))
def _contrastive_device(feats_, labels_, *, temperature, base_temperature):
    """feats_: (A, V, D) float; labels_: (A,) float. Returns scalar loss."""
    A, V, D = feats_.shape
    N = A * V
    n_pad = max(_LANE, _round_up(N, _LANE))
    d_pad = D                                 # no lane padding: block last dim == full dim
    tm, vmem_limit = _pick_tile_and_vmem(n_pad, d_pad)
    num_tiles = n_pad // tm

    # contrast_feature = cat(unbind(feats_, dim=1), dim=0)  -> (V*A, D)
    contrast = jnp.transpose(feats_.astype(jnp.float32), (1, 0, 2)).reshape(N, D)
    f_bf16 = jnp.pad(contrast, ((0, n_pad - N), (0, 0))).astype(jnp.bfloat16)

    lab = jnp.tile(labels_.astype(jnp.float32), V)                      # (N,)
    lab_p = jnp.pad(lab, (0, n_pad - N), constant_values=_SENTINEL)
    valid = (jnp.arange(n_pad) < N).astype(jnp.float32)
    col_bias = (valid - 1.0) * jnp.float32(_NEG_BIG)                    # 0 / -BIG

    # Column-side metadata (lane-dense): row 0 = labels, row 1 = additive bias.
    cmeta = jnp.zeros((8, n_pad), jnp.float32).at[0].set(lab_p).at[1].set(col_bias)
    # Row-side metadata (resident, sliced per tile): col 0 = labels, col 1 = valid.
    rmeta = (jnp.zeros((n_pad, 8), jnp.float32)
             .at[:, 0].set(lab_p).at[:, 1].set(valid))

    kernel = functools.partial(_contrastive_tile_kernel, tm=tm,
                               temperature=float(temperature),
                               base_temperature=float(base_temperature))

    cost = pl.CostEstimate(
        flops=2 * n_pad * n_pad * d_pad,
        transcendentals=2 * n_pad * n_pad,
        bytes_accessed=(n_pad * d_pad * 2 + 8 * n_pad * 4 + n_pad * 8 * 4
                        + num_tiles * 8 * _LANE * 4))

    # Whole-array VMEM-resident operands: single buffer, copied in once.
    resident_spec = pl.BlockSpec(memory_space=pltpu.MemorySpace.VMEM)

    out = pl.pallas_call(
        kernel,
        out_shape=jax.ShapeDtypeStruct((num_tiles, 8, _LANE), jnp.float32),
        grid=(num_tiles,),
        in_specs=[resident_spec, resident_spec, resident_spec],
        out_specs=pl.BlockSpec((1, 8, _LANE), lambda i: (i, 0, 0)),
        compiler_params=pltpu.CompilerParams(
            dimension_semantics=("parallel",),      # row tiles are independent
            vmem_limit_bytes=vmem_limit),
        cost_estimate=cost,
    )(f_bf16, rmeta, cmeta)

    return jnp.sum(out[:, 0, 0]) / jnp.sum(out[:, 1, 0])


def contrastive_loss_pallas(feats_, labels_, *, temperature, base_temperature):
    """feats_: (total_classes, n_view, D); labels_: (total_classes,)."""
    feats_ = jnp.asarray(feats_, jnp.float32)
    labels_ = jnp.asarray(labels_, jnp.float32)
    return _contrastive_device(feats_, labels_,
                               temperature=float(temperature),
                               base_temperature=float(base_temperature))


# ----------------------------------------------------------------------------
# Host glue: label interpolation + hard anchor sampling (dynamic shapes / RNG)
# ----------------------------------------------------------------------------
def nearest_interpolate_labels(labels, out_hw):
    """PyTorch F.interpolate(mode='nearest') on (B, H, W) integer labels."""
    B, H, W = labels.shape
    Ho, Wo = out_hw
    hi = (np.arange(Ho) * H // Ho).astype(np.int64)
    wi = (np.arange(Wo) * W // Wo).astype(np.int64)
    return labels[:, hi[:, None], wi[None, :]]


# TODO(synk): unique / nonzero / randperm produce dynamic shapes; kept as host
# glue (numpy) rather than faked inside the kernel.
def hard_anchor_sampling(X, y_hat, y, *, max_samples, max_views, ignore_label, rng):
    batch_size, _, feat_dim = X.shape
    classes, total_classes = [], 0
    for ii in range(batch_size):
        this_y = y_hat[ii]
        uniq = np.unique(this_y)
        this_classes = [c for c in uniq if c not in ignore_label]
        this_classes = [c for c in this_classes
                        if (this_y == c).sum() > max_views]
        classes.append(this_classes)
        total_classes += len(this_classes)
    if total_classes == 0:
        return None, None
    n_view = min(max_samples // total_classes, max_views)

    X_ = np.zeros((total_classes, n_view, feat_dim), np.float32)
    y_ = np.zeros((total_classes,), np.float32)
    ptr = 0
    for ii in range(batch_size):
        this_y_hat, this_y = y_hat[ii], y[ii]
        for cls_id in classes[ii]:
            hard = np.nonzero((this_y_hat == cls_id) & (this_y != cls_id))[0]
            easy = np.nonzero((this_y_hat == cls_id) & (this_y == cls_id))[0]
            nh, ne = len(hard), len(easy)
            if nh >= n_view / 2 and ne >= n_view / 2:
                nhk = n_view // 2
                nek = n_view - nhk
            elif nh >= n_view / 2:
                nek = ne
                nhk = n_view - nek
            elif ne >= n_view / 2:
                nhk = nh
                nek = n_view - nhk
            else:
                raise Exception("insufficient hard/easy samples")
            hard = hard[rng.permutation(nh)[:nhk]]
            easy = easy[rng.permutation(ne)[:nek]]
            idx = np.concatenate([hard, easy])
            X_[ptr] = X[ii, idx, :]
            y_[ptr] = cls_id
            ptr += 1
    return X_, y_


class PixelContrastLossPallas:
    def __init__(self, ARCH):
        c = ARCH['contrastive']
        self.max_samples = c['max_samples']
        self.max_views = c['max_views']
        self.temperature = c['temperature']
        self.base_temperature = c['base_temperature']
        self.ignore_label = c['loss_w']

    def __call__(self, feats, labels, predict, rng):
        feats = np.asarray(feats, np.float32)   # (B, C, H, W)
        labels = np.asarray(labels)             # (B, H_lab, W_lab)
        predict = np.asarray(predict)           # (B, H, W)
        B, C, H, W = feats.shape
        labels = nearest_interpolate_labels(labels, (H, W)).astype(np.int64)
        labels = labels.reshape(B, -1)
        predict = predict.reshape(B, -1)
        feats_nhwc = np.transpose(feats, (0, 2, 3, 1)).reshape(B, -1, C)

        X_, y_ = hard_anchor_sampling(
            feats_nhwc, labels, predict,
            max_samples=self.max_samples, max_views=self.max_views,
            ignore_label=self.ignore_label, rng=rng)
        if X_ is None:
            return None
        return contrastive_loss_pallas(
            X_, y_, temperature=self.temperature,
            base_temperature=self.base_temperature)


# ----------------------------------------------------------------------------
# Pure numpy reference of _contrastive (for sanity check)
# ----------------------------------------------------------------------------
def contrastive_ref(X_, y_, T, bT):
    A, V, D = X_.shape
    F = np.transpose(np.asarray(X_, np.float32), (1, 0, 2)).reshape(V * A, D)
    lab = np.tile(np.asarray(y_, np.float32), V)
    with np.errstate(divide="ignore", invalid="ignore"):
        s = (F @ F.T) / T
        row_max = s.max(1, keepdims=True)
        logits = s - row_max
        eq = (lab[:, None] == lab[None, :]).astype(np.float32)
        mask = eq * (1.0 - np.eye(V * A, dtype=np.float32))
        neg_mask = 1.0 - eq
        neg = (np.exp(logits) * neg_mask).sum(1, keepdims=True)
        log_prob = logits - np.log(np.exp(logits) + neg)
        mlpp = (mask * log_prob).sum(1) / mask.sum(1)
        return float((-(T / bT) * mlpp).mean())


if __name__ == "__main__":
    ARCH = {'contrastive': {'max_samples': 64, 'max_views': 8,
                            'temperature': 0.1, 'base_temperature': 0.07,
                            'loss_w': [0]}}
    T = ARCH['contrastive']['temperature']
    bT = ARCH['contrastive']['base_temperature']

    B, C, H, W = 2, 32, 16, 16          # feats NCHW
    HL, WL = 32, 32                     # labels at higher resolution

    key = jax.random.PRNGKey(0)
    kf, kl, kp1, kp2 = jax.random.split(key, 4)
    feats = jax.random.normal(kf, (B, C, H, W), dtype=jnp.float32)
    # Projection-head embeddings fed to this loss are L2-normalized in real
    # training; unnormalized random features push exp()/log() into an
    # over/underflow regime where even the PyTorch reference is NaN.
    feats = feats / (jnp.linalg.norm(feats, axis=1, keepdims=True) + 1e-12)
    labels = jax.random.randint(kl, (B, HL, WL), 0, 4, dtype=jnp.int32)

    # predict: downsampled labels with ~30% random flips (gives hard+easy pixels)
    lab_np = np.asarray(labels)
    pred = nearest_interpolate_labels(lab_np, (H, W)).copy()
    flip = np.asarray(jax.random.uniform(kp1, (B, H, W)) < 0.3)
    rand_cls = np.asarray(jax.random.randint(kp2, (B, H, W), 0, 4))
    pred = np.where(flip, rand_cls, pred).astype(np.int64)

    # --- manual path (sampled anchors kept so the reference sees the same data)
    feats_np = np.asarray(feats)
    labels_interp = nearest_interpolate_labels(lab_np, (H, W)).reshape(B, -1)
    feats_nhwc = np.transpose(feats_np, (0, 2, 3, 1)).reshape(B, -1, C)
    rng = np.random.default_rng(0)
    X_, y_ = hard_anchor_sampling(
        feats_nhwc, labels_interp.astype(np.int64), pred.reshape(B, -1),
        max_samples=ARCH['contrastive']['max_samples'],
        max_views=ARCH['contrastive']['max_views'],
        ignore_label=ARCH['contrastive']['loss_w'], rng=rng)
    assert X_ is not None

    loss = contrastive_loss_pallas(X_, y_, temperature=T, base_temperature=bT)
    loss = jax.block_until_ready(loss)
    loss_f = float(loss)

    # References: (a) same math with bf16-rounded matmul operands (the kernel's
    # numerics), (b) the full-f32 PyTorch-equivalent math.
    X_bf = np.asarray(jnp.asarray(X_, jnp.bfloat16).astype(jnp.float32))
    ref_bf = contrastive_ref(X_bf, y_, T, bT)
    ref_32 = contrastive_ref(X_, y_, T, bT)

    assert np.isfinite(loss_f), loss_f
    assert abs(loss_f - ref_bf) < 5e-3 * max(1.0, abs(ref_bf)), (loss_f, ref_bf)
    assert abs(loss_f - ref_32) < 8e-2 * max(1.0, abs(ref_32)), (loss_f, ref_32)

    # --- full module path (same rng seed -> identical sampling -> same loss)
    loss2 = PixelContrastLossPallas(ARCH)(feats, labels, pred,
                                          np.random.default_rng(0))
    loss2 = jax.block_until_ready(loss2)
    assert np.isfinite(float(loss2))
    assert abs(float(loss2) - loss_f) < 1e-5 * max(1.0, abs(loss_f))

    print("KERNEL_OK")
</pallas_src>

<mosaic_0001>
module attributes {stable_mosaic.version = 11 : i64} {
  func.func @_contrastive_tile_kernel(%arg0: i32, %arg1: memref<128x32xbf16, #tpu.memory_space<vmem>>, %arg2: memref<128x8xf32, #tpu.memory_space<vmem>>, %arg3: memref<8x128xf32, #tpu.memory_space<vmem>>, %arg4: memref<1x8x128xf32, #tpu.memory_space<vmem>>) attributes {dimension_semantics = [#tpu.dimension_semantics<parallel>], iteration_bounds = array<i64: 1>, scalar_prefetch = 0 : i64, scratch_operands = 0 : i64, tpu.core_type = #tpu.core_type<tc>, window_params = [{pipeline_mode = #tpu.pipeline_mode<synchronous>, transform_indices = @transform_0, window_bounds = array<i64: 128, 32>}, {pipeline_mode = #tpu.pipeline_mode<synchronous>, transform_indices = @transform_1, window_bounds = array<i64: 128, 8>}, {pipeline_mode = #tpu.pipeline_mode<synchronous>, transform_indices = @transform_2, window_bounds = array<i64: 8, 128>}, {transform_indices = @transform_3, window_bounds = array<i64: 1, 8, 128>}]} {
    %c128_i32 = arith.constant 128 : i32
    %0 = arith.muli %arg0, %c128_i32 : i32
    %1 = tpu.assume_multiple %0, 128 : i32
    %c0 = arith.constant 0 : index
    %c0_0 = arith.constant 0 : index
    %2 = vector.load %arg1[%c0, %c0_0] : memref<128x32xbf16, #tpu.memory_space<vmem>>, vector<128x32xbf16>
    %3 = arith.index_cast %1 : i32 to index
    %c0_1 = arith.constant 0 : index
    %4 = vector.load %arg1[%3, %c0_1] : memref<128x32xbf16, #tpu.memory_space<vmem>>, vector<128x32xbf16>
    %cst = arith.constant dense<0.000000e+00> : vector<128x128xf32>
    %5 = tpu.matmul %4, %2, %cst {dimension_numbers = #tpu.dot_dimension_numbers<[1], [1], [0], [0], [0, 0, 1, 0], [], []>} : vector<128x32xbf16>, vector<128x32xbf16>, vector<128x128xf32> -> vector<128x128xf32>
    %cst_2 = arith.constant 1.000000e+01 : f32
    %6 = vector.broadcast %cst_2 : f32 to vector<128x128xf32>
    %7 = arith.mulf %5, %6 : vector<128x128xf32>
    %c0_3 = arith.constant 0 : index
    %c0_4 = arith.constant 0 : index
    %8 = vector.load %arg3[%c0_3, %c0_4] : memref<8x128xf32, #tpu.memory_space<vmem>>, vector<1x128xf32>
    %c1 = arith.constant 1 : index
    %c0_5 = arith.constant 0 : index
    %9 = vector.load %arg3[%c1, %c0_5] : memref<8x128xf32, #tpu.memory_space<vmem>>, vector<1x128xf32>
    %10 = arith.index_cast %1 : i32 to index
    %c0_6 = arith.constant 0 : index
    %11 = vector.load %arg2[%10, %c0_6] : memref<128x8xf32, #tpu.memory_space<vmem>>, vector<128x1xf32>
    %12 = arith.index_cast %1 : i32 to index
    %c1_7 = arith.constant 1 : index
    %13 = vector.load %arg2[%12, %c1_7] : memref<128x8xf32, #tpu.memory_space<vmem>>, vector<128x1xf32>
    %14 = vector.broadcast %9 : vector<1x128xf32> to vector<128x128xf32>
    %15 = arith.addf %7, %14 : vector<128x128xf32>
    %cst_8 = arith.constant dense<0xFF800000> : vector<128xf32>
    %16 = vector.multi_reduction <maximumf>, %15, %cst_8 [1] : vector<128x128xf32> to vector<128xf32>
    %17 = vector.shape_cast %16 : vector<128xf32> to vector<128x1xf32>
    %18 = vector.broadcast %17 : vector<128x1xf32> to vector<128x128xf32>
    %19 = arith.subf %15, %18 : vector<128x128xf32>
    %20 = math.exp %19 : vector<128x128xf32>
    %21 = vector.broadcast %11 : vector<128x1xf32> to vector<128x128xf32>
    %22 = vector.broadcast %8 : vector<1x128xf32> to vector<128x128xf32>
    %23 = arith.cmpf oeq, %21, %22 : vector<128x128xf32>
    %cst_9 = arith.constant dense<0.000000e+00> : vector<128xf32>
    %24 = vector.multi_reduction <add>, %20, %cst_9 [1] : vector<128x128xf32> to vector<128xf32>
    %25 = vector.shape_cast %24 : vector<128xf32> to vector<128x1xf32>
    %cst_10 = arith.constant 0.000000e+00 : f32
    %26 = vector.broadcast %cst_10 : f32 to vector<128x128xf32>
    %27 = arith.select %23, %20, %26 : vector<128x128xi1>, vector<128x128xf32>
    %cst_11 = arith.constant dense<0.000000e+00> : vector<128xf32>
    %28 = vector.multi_reduction <add>, %27, %cst_11 [1] : vector<128x128xf32> to vector<128xf32>
    %29 = vector.shape_cast %28 : vector<128xf32> to vector<128x1xf32>
    %30 = arith.subf %25, %29 : vector<128x1xf32>
    %31 = vector.broadcast %30 : vector<128x1xf32> to vector<128x128xf32>
    %32 = arith.addf %20, %31 : vector<128x128xf32>
    %cst_12 = arith.constant 9.99999991E-38 : f32
    %33 = vector.broadcast %cst_12 : f32 to vector<128x128xf32>
    %34 = arith.maximumf %32, %33 : vector<128x128xf32>
    %35 = math.log %34 : vector<128x128xf32>
    %36 = arith.subf %19, %35 : vector<128x128xf32>
    %cst_13 = arith.constant 0.000000e+00 : f32
    %37 = vector.broadcast %cst_13 : f32 to vector<128x128xf32>
    %38 = arith.select %23, %36, %37 : vector<128x128xi1>, vector<128x128xf32>
    %cst_14 = arith.constant dense<0.000000e+00> : vector<128xf32>
    %39 = vector.multi_reduction <add>, %38, %cst_14 [1] : vector<128x128xf32> to vector<128xf32>
    %40 = vector.shape_cast %39 : vector<128xf32> to vector<128x1xf32>
    %cst_15 = arith.constant 1.000000e+00 : f32
    %cst_16 = arith.constant 0.000000e+00 : f32
    %41 = vector.broadcast %cst_15 : f32 to vector<128x128xf32>
    %42 = vector.broadcast %cst_16 : f32 to vector<128x128xf32>
    %43 = arith.select %23, %41, %42 : vector<128x128xi1>, vector<128x128xf32>
    %cst_17 = arith.constant dense<0.000000e+00> : vector<128xf32>
    %44 = vector.multi_reduction <add>, %43, %cst_17 [1] : vector<128x128xf32> to vector<128xf32>
    %45 = vector.shape_cast %44 : vector<128xf32> to vector<128x1xf32>
    %cst_18 = arith.constant 1.000000e+00 : f32
    %46 = vector.broadcast %cst_18 : f32 to vector<128x1xf32>
    %47 = arith.subf %45, %46 : vector<128x1xf32>
    %48 = arith.extf %4 : vector<128x32xbf16> to vector<128x32xf32>
    %49 = arith.mulf %48, %48 : vector<128x32xf32>
    %cst_19 = arith.constant dense<0.000000e+00> : vector<128xf32>
    %50 = vector.multi_reduction <add>, %49, %cst_19 [1] : vector<128x32xf32> to vector<128xf32>
    %51 = vector.shape_cast %50 : vector<128xf32> to vector<128x1xf32>
    %cst_20 = arith.constant 1.000000e+01 : f32
    %52 = vector.broadcast %cst_20 : f32 to vector<128x1xf32>
    %53 = arith.mulf %51, %52 : vector<128x1xf32>
    %54 = arith.subf %53, %17 : vector<128x1xf32>
    %55 = math.exp %54 : vector<128x1xf32>
    %56 = arith.addf %55, %30 : vector<128x1xf32>
    %cst_21 = arith.constant 9.99999991E-38 : f32
    %57 = vector.broadcast %cst_21 : f32 to vector<128x1xf32>
    %58 = arith.maximumf %56, %57 : vector<128x1xf32>
    %59 = math.log %58 : vector<128x1xf32>
    %60 = arith.subf %54, %59 : vector<128x1xf32>
    %61 = arith.subf %40, %60 : vector<128x1xf32>
    %cst_22 = arith.constant 1.000000e+00 : f32
    %62 = vector.broadcast %cst_22 : f32 to vector<128x1xf32>
    %63 = arith.maximumf %47, %62 : vector<128x1xf32>
    %64 = arith.divf %61, %63 : vector<128x1xf32>
    %cst_23 = arith.constant -1.42857146 : f32
    %65 = vector.broadcast %cst_23 : f32 to vector<128x1xf32>
    %66 = arith.mulf %65, %64 : vector<128x1xf32>
    %67 = arith.mulf %66, %13 : vector<128x1xf32>
    %cst_24 = arith.constant dense<0.000000e+00> : vector<1xf32>
    %68 = vector.multi_reduction <add>, %67, %cst_24 [0] : vector<128x1xf32> to vector<1xf32>
    %69 = vector.shape_cast %68 : vector<1xf32> to vector<1x1xf32>
    %cst_25 = arith.constant dense<0.000000e+00> : vector<1xf32>
    %70 = vector.multi_reduction <add>, %13, %cst_25 [0] : vector<128x1xf32> to vector<1xf32>
    %71 = vector.shape_cast %70 : vector<1xf32> to vector<1x1xf32>
    %72 = vector.shape_cast %69 : vector<1x1xf32> to vector<1x1xf32>
    %73 = vector.broadcast %72 : vector<1x1xf32> to vector<1x128xf32>
    %c0_26 = arith.constant 0 : index
    %c0_27 = arith.constant 0 : index
    %c0_28 = arith.constant 0 : index
    %74 = vector.load %arg4[%c0_26, %c0_27, %c0_28] : memref<1x8x128xf32, #tpu.memory_space<vmem>>, vector<1x1x128xf32>
    %75 = vector.shape_cast %74 : vector<1x1x128xf32> to vector<1x128xf32>
    %76 = vector.shape_cast %73 : vector<1x128xf32> to vector<1x1x128xf32>
    tpu.vector_store %arg4[%c0_26, %c0_27, %c0_28], %76 {strides = array<i32>} : memref<1x8x128xf32, #tpu.memory_space<vmem>>, vector<1x1x128xf32>,
    %77 = vector.shape_cast %71 : vector<1x1xf32> to vector<1x1xf32>
    %78 = vector.broadcast %77 : vector<1x1xf32> to vector<1x128xf32>
    %c0_29 = arith.constant 0 : index
    %c1_30 = arith.constant 1 : index
    %c0_31 = arith.constant 0 : index
    %79 = vector.load %arg4[%c0_29, %c1_30, %c0_31] : memref<1x8x128xf32, #tpu.memory_space<vmem>>, vector<1x1x128xf32>
    %80 = vector.shape_cast %79 : vector<1x1x128xf32> to vector<1x128xf32>
    %81 = vector.shape_cast %78 : vector<1x128xf32> to vector<1x1x128xf32>
    tpu.vector_store %arg4[%c0_29, %c1_30, %c0_31], %81 {strides = array<i32>} : memref<1x8x128xf32, #tpu.memory_space<vmem>>, vector<1x1x128xf32>,
    return
  }
  func.func @transform_0(%arg0: i32) -> (i32, i32) {
    %c0_i32 = arith.constant 0 : i32
    %c0_i32_0 = arith.constant 0 : i32
    %c0_i32_1 = arith.constant 0 : i32
    return %c0_i32, %c0_i32_0 : i32, i32
  }
  func.func @transform_1(%arg0: i32) -> (i32, i32) {
    %c0_i32 = arith.constant 0 : i32
    %c0_i32_0 = arith.constant 0 : i32
    %c0_i32_1 = arith.constant 0 : i32
    return %c0_i32, %c0_i32_0 : i32, i32
  }
  func.func @transform_2(%arg0: i32) -> (i32, i32) {
    %c0_i32 = arith.constant 0 : i32
    %c0_i32_0 = arith.constant 0 : i32
    %c0_i32_1 = arith.constant 0 : i32
    return %c0_i32, %c0_i32_0 : i32, i32
  }
  func.func @transform_3(%arg0: i32) -> (i32, i32, i32) {
    %c0_i32 = arith.constant 0 : i32
    %c0_i32_0 = arith.constant 0 : i32
    %c0_i32_1 = arith.constant 0 : i32
    return %arg0, %c0_i32, %c0_i32_0 : i32, i32, i32
  }
}

</mosaic_0001>

<bundles_post_ra>
// kernel: tile.9
= control target key start
LH: loop header
LB: loop body
LE: loop exit
PB: predicated region body
PF: predicated region fallthrough
CT: control target
= control target key end

     0   :  { %s69_s10 = smov 42   ;;  %s70_s11 = smov 30   ;;  %vm3_vm0 = vcmask 48128   ;;  %vm9_vm1 = vcmask 392528   ;;  %vm15_vm2 = vcmask 343328   ;;  %vm21_vm3 = vcmask 294128   ;;  %s113_s0 = inlined_call_operand.vmem [shape: f32[8,6], index: 0, kind: input, shape index: {}]   ;;  %s114_s1 = inlined_call_operand.vmem [shape: f32[48], index: 1, kind: output, shape index: {}]  }
   0x1   :  { %v55_v0 = vld [vmem:[%s113_s0 + $0x7] sm:$0x1]   ;;  %v57_v1 = vld [vmem:[%s113_s0 + $0x5] sm:$0x1]   ;;  %v56_v2 = vld [vmem:[%s113_s0 + $0x6] sm:$0x1]  }
   0x2   :  { %7 = vrot.lane.b32.xlu0 %v55_v0, %s69_s10  ;;  %19 = vrot.lane.b32.xlu1 %v57_v1, %s70_s11  ;;  %v58_v3 = vld [vmem:[%s113_s0 + $0x4] sm:$0x1]   ;;  %v2_v4 = vld [vmem:[%s113_s0] sm:$0x1]   ;;  %s71_s18 = smov 36   ;;  %s72_s19 = smov 24  }
   0x3   :  { %4 = vst.msk [vmem:[#allocation0] sm:$0x1] %vm3_vm0, %v2_v4   ;;  %v59_v5 = vld [vmem:[%s113_s0 + $0x3] sm:$0x1]   ;;  %v60_v6 = vld [vmem:[%s113_s0 + $0x2] sm:$0x1]  }
   0x4   :  { %s73_s24 = smov 18   ;;  %s74_s25 = smov 12   ;;  %v61_v7 = vld [vmem:[%s113_s0 + $0x1] sm:$0x1]   ;;  %vm27_vm4 = vcmask 244928   ;;  %vm33_vm5 = vcmask 195728  }
   0x5   :  { %s75_s0 = smov 6   ;;  %vm39_vm6 = vcmask 146528   ;;  %vm45_vm7 = vcmask 97328  }
   0x6   :  { %13 = vrot.lane.b32.xlu0 %v56_v2, %s71_s18  ;;  %25 = vrot.lane.b32.xlu1 %v58_v3, %s72_s19 }
   0xa   :  { %31 = vrot.lane.b32.xlu0 %v59_v5, %s73_s24  ;;  %37 = vrot.lane.b32.xlu1 %v60_v6, %s74_s25 }
   0xe   :  { %43 = vrot.lane.b32.xlu0 %v61_v7, %s75_s0 }
  0x74   :  { %v8_v8 = vpop.permute.xlu0 %7   ;;  %v20_v9 = vpop.permute.xlu1 %19  }
  0x75   :  { %10 = vst.msk [vmem:[#allocation0] sm:$0x1] %vm9_vm1, %v8_v8  }
  0x78   :  { %v14_v10 = vpop.permute.xlu0 %13   ;;  %v26_v11 = vpop.permute.xlu1 %25  }
  0x79   :  { %16 = vst.msk [vmem:[#allocation0] sm:$0x1] %vm15_vm2, %v14_v10  }
  0x7a   :  { %22 = vst.msk [vmem:[#allocation0] sm:$0x1] %vm21_vm3, %v20_v9  }
  0x7b   :  { %28 = vst.msk [vmem:[#allocation0] sm:$0x1] %vm27_vm4, %v26_v11  }
  0x7c   :  { %v32_v12 = vpop.permute.xlu0 %31   ;;  %v38_v13 = vpop.permute.xlu1 %37  }
  0x7d   :  { %34 = vst.msk [vmem:[#allocation0] sm:$0x1] %vm33_vm5, %v32_v12  }
  0x7e   :  { %40 = vst.msk [vmem:[#allocation0] sm:$0x1] %vm39_vm6, %v38_v13  }
  0x80   :  { %v44_v14 = vpop.permute.xlu0 %43  }
  0x81   :  { %46 = vst.msk [vmem:[#allocation0] sm:$0x1] %vm45_vm7, %v44_v14  }
  0x88   :  { %v51_v15 = vld [vmem:[#allocation0] sm:$0x1] }
  0x89   :  { %54 = vst [vmem:[%s114_s1] sm:$0x1] %v51_v15 }

// kernel: tile.8
= control target key start
LH: loop header
LB: loop body
LE: loop exit
PB: predicated region body
PF: predicated region fallthrough
CT: control target
= control target key end

     0   :  { %s22_s0 = inlined_call_operand.vmem [shape: f32[6], index: 0, kind: input, shape index: {}]   ;;  %s23_s1 = inlined_call_operand.vmem [shape: f32[8,6], index: 1, kind: output, shape index: {}]  }
   0x1   :  { %v4_v0 = vld [vmem:[%s22_s0] ss:$0 sm:$0xff] }
   0x2   :  { %5 = vst [vmem:[%s23_s1] sm:$0xff] %v4_v0 }

// kernel: _contrastive_device.1
= control target key start
LH: loop header
LB: loop body
LE: loop exit
PB: predicated region body
PF: predicated region fallthrough
CT: control target
= control target key end

     0   :  { %vm132_vm0 = vcmask 261120   ;;  %v1543_v1 = vmov 0   ;;  %s2577_s0 = inlined_call_operand.vmem [shape: bf16[128,32], index: 0, kind: input, shape index: {}]   ;;  %s2578_s1 = inlined_call_operand.vmem [shape: f32[128,8], index: 1, kind: input, shape index: {}]   ;;  %s2579_s2 = inlined_call_operand.vmem [shape: f32[8,128], index: 2, kind: input, shape index: {}]   ;;  %s2580_s3 = inlined_call_operand.vmem [shape: f32[1,8,128], index: 3, kind: output, shape index: {}]  }
   0x1   :  { %v1343_v0 = vld [vmem:[%s2577_s0 + $0x38] sm:$0xff]   ;;  %1340 = vset.pattern.permute.xlu1 %v1543_v1  ;;  %1339 = vset.pattern.permute.xlu0 %v1543_v1  ;;  %v1344_v2 = vld [vmem:[%s2577_s0 + $0x30] sm:$0xff]   ;;  %v1345_v5 = vld [vmem:[%s2577_s0 + $0x28] sm:$0xff]  }
   0x2   :  { %1320 = vmatprep.subr.msk.bf16.mxu0 %vm132_vm0, %v1343_v0  ;;  %1321 = vmatprep.subr.msk.bf16.mxu1 %vm132_vm0, %v1343_v0  ;;  %v179_v3 = vsel %vm132_vm0, %v1343_v0, 0  ;;  %v176_v4 = vsel %vm132_vm0, %v1344_v2, 0  ;;  %v1584_v6 = vld [vmem:[%s2577_s0] sm:$0xff]   ;;  %v1594_v8 = vld [vmem:[%s2578_s1 + $0x8] sm:$0xff]  ;;  %v1611_v10 = vld [vmem:[%s2578_s1 + $0x18] sm:$0xff]  ;;  %v173_v11 = vsel %vm132_vm0, %v1345_v5, 0 }
   0x3   :  { %1273 = vmatpush3.bf16.xpose.msra.mxu0 %v179_v3  ;;  %1312 = vmatpush3.bf16.xpose.msra.mxu1 %v179_v3  ;;  %v1589_v7 = vld [vmem:[%s2577_s0 + $0x20] sm:$0xff]   ;;  %v1622_v13 = vld [vmem:[%s2578_s1 + $0x10] sm:$0xff]  ;;  %v304_v15 = vld [vmem:[%s2578_s1 + $0x38] sm:$0xff] }
   0x4   :  { %1322 = vmatprep.subr.msk.bf16.mxu0 %vm132_vm0, %v1344_v2  ;;  %1323 = vmatprep.subr.msk.bf16.mxu1 %vm132_vm0, %v1344_v2  ;;  %v1606_v9 = vld [vmem:[%s2578_s1] sm:$0xff]  ;;  %v1639_v16 = vld [vmem:[%s2578_s1 + $0x28] sm:$0xff]  ;;  %v1347_v18 = vld [vmem:[%s2577_s0 + $0x18] sm:$0xff]  }
   0x5   :  { %1288 = vmatprep.mubr.msk.bf16.mxu0 %vm132_vm0, %v1584_v6  ;;  %1296 = vmatprep.mubr.msk.bf16.mxu1 %vm132_vm0, %v1589_v7  ;;  %v1346_v12 = vld [vmem:[%s2577_s0 + $0x20] sm:$0xff]   ;;  %v310_v19 = vld [vmem:[%s2578_s1 + $0x68] sm:$0xff]  ;;  %v1652_v20 = vld [vmem:[%s2578_s1 + $0x30] sm:$0xff]  ;;  %v167_v22 = vsel %vm132_vm0, %v1347_v18, 0 }
   0x6   :  { %420 = vperm.xlu1 %1340, %v1594_v8   ;;  %415 = vperm.xlu0 %1339, %v1606_v9   ;;  %v1627_v14 = vld [vmem:[%s2578_s1 + $0x20] sm:$0xff]  ;;  %v170_v17 = vsel %vm132_vm0, %v1346_v12, 0  ;;  %v1348_v23 = vld [vmem:[%s2577_s0 + $0x10] sm:$0xff]   ;;  %v306_v24 = vld [vmem:[%s2578_s1 + $0x48] sm:$0xff] }
   0x7   :  { %v305_v21 = vld [vmem:[%s2578_s1 + $0x40] sm:$0xff]  ;;  %v307_v25 = vld [vmem:[%s2578_s1 + $0x50] sm:$0xff]  ;;  %v164_v26 = vsel %vm132_vm0, %v1348_v23, 0  ;;  %v1349_v27 = vld [vmem:[%s2577_s0 + $0x8] sm:$0xff]  }
   0x8   :  { %v308_v28 = vld [vmem:[%s2578_s1 + $0x58] sm:$0xff]  ;;  %v309_v29 = vld [vmem:[%s2578_s1 + $0x60] sm:$0xff]  ;;  %v161_v30 = vsel %vm132_vm0, %v1349_v27, 0  ;;  %v1694_v33 = vld [vmem:[%s2577_s0 + $0x8] sm:$0xff]  }
   0x9   :  { %v1350_v31 = vld [vmem:[%s2577_s0] sm:$0xff]   ;;  %v1699_v34 = vld [vmem:[%s2577_s0 + $0x28] sm:$0xff]   ;;  %v1704_v35 = vld [vmem:[%s2577_s0 + $0x10] sm:$0xff]  }
   0xa   :  { %430 = vperm.xlu1 %1340, %v1611_v10   ;;  %425 = vperm.xlu0 %1339, %v1622_v13   ;;  %v158_v32 = vsel %vm132_vm0, %v1350_v31, 0  ;;  %v1709_v36 = vld [vmem:[%s2577_s0 + $0x30] sm:$0xff]   ;;  %v1722_v37 = vld [vmem:[%s2577_s0 + $0x18] sm:$0xff]   ;;  %v1238_v41 = vld [vmem:[%s2579_s2 + $0x1] ss:$0 sm:$0xff] }
   0xb   :  { %1275 = vmatpush3.bf16.xpose.msra.mxu0 %v176_v4  ;;  %1313 = vmatpush3.bf16.xpose.msra.mxu1 %v176_v4  ;;  %v1727_v38 = vld [vmem:[%s2577_s0 + $0x38] sm:$0xff]  }
   0xc   :  { %1324 = vmatprep.subr.msk.bf16.mxu0 %vm132_vm0, %v1345_v5  ;;  %1325 = vmatprep.subr.msk.bf16.mxu1 %vm132_vm0, %v1345_v5 }
   0xe   :  { %435 = vperm.xlu1 %1340, %v1627_v14   ;;  %450 = vperm.xlu0 %1339, %v304_v15  }
  0x12   :  { %440 = vperm.xlu1 %1340, %v1639_v16   ;;  %480 = vperm.xlu0 %1339, %v310_v19  }
  0x13   :  { %1277 = vmatpush3.bf16.xpose.msra.mxu0 %v173_v11  ;;  %1314 = vmatpush3.bf16.xpose.msra.mxu1 %v173_v11 }
  0x14   :  { %1326 = vmatprep.subr.msk.bf16.mxu0 %vm132_vm0, %v1346_v12  ;;  %1327 = vmatprep.subr.msk.bf16.mxu1 %vm132_vm0, %v1346_v12 }
  0x16   :  { %445 = vperm.xlu1 %1340, %v1652_v20  }
  0x1a   :  { %455 = vperm.xlu1 %1340, %v305_v21  }
  0x1b   :  { %1279 = vmatpush3.bf16.xpose.msra.mxu0 %v170_v17  ;;  %1315 = vmatpush3.bf16.xpose.msra.mxu1 %v170_v17 }
  0x1c   :  { %1328 = vmatprep.subr.msk.bf16.mxu0 %vm132_vm0, %v1347_v18  ;;  %1329 = vmatprep.subr.msk.bf16.mxu1 %vm132_vm0, %v1347_v18 }
  0x1e   :  { %460 = vperm.xlu1 %1340, %v306_v24  }
  0x22   :  { %465 = vperm.xlu1 %1340, %v307_v25  }
  0x23   :  { %1281 = vmatpush3.bf16.xpose.msra.mxu0 %v167_v22  ;;  %1316 = vmatpush3.bf16.xpose.msra.mxu1 %v167_v22 }
  0x24   :  { %1330 = vmatprep.subr.msk.bf16.mxu0 %vm132_vm0, %v1348_v23  ;;  %1331 = vmatprep.subr.msk.bf16.mxu1 %vm132_vm0, %v1348_v23 }
  0x26   :  { %470 = vperm.xlu1 %1340, %v308_v28  }
  0x2a   :  { %475 = vperm.xlu1 %1340, %v309_v29  }
  0x2b   :  { %1283 = vmatpush3.bf16.xpose.msra.mxu0 %v164_v26  ;;  %1317 = vmatpush3.bf16.xpose.msra.mxu1 %v164_v26 }
  0x2c   :  { %1332 = vmatprep.subr.msk.bf16.mxu0 %vm132_vm0, %v1349_v27  ;;  %1333 = vmatprep.subr.msk.bf16.mxu1 %vm132_vm0, %v1349_v27 }
  0x33   :  { %1285 = vmatpush3.bf16.xpose.msra.mxu0 %v161_v30  ;;  %1318 = vmatpush3.bf16.xpose.msra.mxu1 %v161_v30 }
  0x34   :  { %1334 = vmatprep.subr.msk.bf16.mxu0 %vm132_vm0, %v1350_v31  ;;  %1335 = vmatprep.subr.msk.bf16.mxu1 %vm132_vm0, %v1350_v31 }
  0x3b   :  { %1287 = vmatpush3.bf16.xpose.msra.mxu0 %v158_v32  ;;  %1319 = vmatpush3.bf16.xpose.msra.mxu1 %v158_v32 }
  0x42   :  { %1289 = vmatmul.mubr.msk.bf16.vlgmr.msra.gmra.mxu0 %vm132_vm0, %v1694_v33  ;;  %1297 = vmatmul.mubr.msk.bf16.vlgmr.msra.gmra.mxu1 %vm132_vm0, %v1699_v34 }
  0x43   :  { %1292 = vmatprep.mubr.msk.bf16.mxu0 %vm132_vm0, %v1704_v35  ;;  %1300 = vmatprep.mubr.msk.bf16.mxu1 %vm132_vm0, %v1709_v36 }
  0x4a   :  { %1293 = vmatmul.mubr.msk.bf16.gmra.mxu0 %vm132_vm0, %v1722_v37  ;;  %1301 = vmatmul.mubr.msk.bf16.gmra.mxu1 %vm132_vm0, %v1727_v38 }
 0x102   :  { %v1290_v39 = vpop.f32.mrf.mxu0  ;;  %v1298_v40 = vpop.f32.mrf.mxu1 }
 0x103   :  { %v280_v42 = vmul.f32 10.0, %v1290_v39  ;;  %v288_v43 = vmul.f32 10.0, %v1298_v40  ;;  %v1787_v39 = vld [vmem:[%s2578_s1 + $0x70] sm:$0xff]  ;;  %v1793_v40 = vld [vmem:[%s2578_s1 + $0x78] sm:$0xff] }
 0x104   :  { %v215_v44 = vpop.f32.mrf.mxu0  ;;  %v247_v45 = vpop.f32.mrf.mxu1  ;;  %2613 = vst [vmem:[#allocation2_spill] sm:$0xff] %v1787_v39  ;;  %2614 = vst [vmem:[#allocation3_spill] sm:$0xff] %v1793_v40 }
 0x105   :  { %v278_v46 = vmul.f32 10.0, %v215_v44  ;;  %v1736_v47 = vadd.f32 %v1238_v41, %v288_v43  ;;  %v1738_v48 = vadd.f32 %v1238_v41, %v280_v42  ;;  %v286_v53 = vmul.f32 10.0, %v247_v45 }
 0x106   :  { %v1291_v49 = vpop.f32.mrf.mxu0  ;;  %v1299_v50 = vpop.f32.mrf.mxu1 }
 0x107   :  { %v281_v51 = vmul.f32 10.0, %v1291_v49  ;;  %353 = vmax.xlane.f32.xlu0 %v1736_v47  ;;  %337 = vmax.xlane.f32.xlu1 %v1738_v48  ;;  %v289_v54 = vmul.f32 10.0, %v1299_v50  ;;  %v1742_v55 = vadd.f32 %v1238_v41, %v278_v46  ;;  %v1748_v63 = vadd.f32 %v1238_v41, %v286_v53  ;;  %v1810_v50 = vpop.permute.xlu0 %415 }
 0x108   :  { %v218_v52 = vpop.f32.mrf.mxu0  ;;  %v250_v57 = vpop.f32.mrf.mxu1 }
 0x109   :  { %v1744_v56 = vadd.f32 %v1238_v41, %v281_v51  ;;  %v279_v61 = vmul.f32 10.0, %v218_v52  ;;  %v287_v62 = vmul.f32 10.0, %v250_v57  ;;  %v1750_v0 = vadd.f32 %v1238_v41, %v289_v54 }
 0x10a   :  { %v1294_v58 = vpop.f32.mrf.mxu0  ;;  %v1302_v59 = vpop.f32.mrf.mxu1 }
 0x10b   :  { %333 = vmax.xlane.f32.xlu0 %v1742_v55  ;;  %339 = vmax.xlane.f32.xlu1 %v1744_v56  ;;  %v284_v1 = vmul.f32 10.0, %v1294_v58  ;;  %v292_v2 = vmul.f32 10.0, %v1302_v59  ;;  %v1754_v5 = vadd.f32 %v1238_v41, %v287_v62  ;;  %v1756_v11 = vadd.f32 %v1238_v41, %v279_v61  ;;  %v1814_v52 = vpop.permute.xlu0 %425 }
 0x10c   :  { %v231_v60 = vpop.f32.mrf.mxu0  ;;  %v263_v4 = vpop.f32.mrf.mxu1 }
 0x10d   :  { %v282_v12 = vmul.f32 10.0, %v231_v60  ;;  %v1760_v17 = vadd.f32 %v1238_v41, %v292_v2  ;;  %v1762_v18 = vadd.f32 %v1238_v41, %v284_v1  ;;  %v290_v23 = vmul.f32 10.0, %v263_v4 }
 0x10e   :  { %v1295_v3 = vpop.f32.mrf.mxu0  ;;  %v1303_v21 = vpop.f32.mrf.mxu1 }
 0x10f   :  { %349 = vmax.xlane.f32.xlu0 %v1748_v63  ;;  %355 = vmax.xlane.f32.xlu1 %v1750_v0  ;;  %v285_v15 = vmul.f32 10.0, %v1295_v3  ;;  %v1766_v24 = vadd.f32 %v1238_v41, %v282_v12  ;;  %v293_v27 = vmul.f32 10.0, %v1303_v21  ;;  %v1772_v29 = vadd.f32 %v1238_v41, %v290_v23  ;;  %v1818_v54 = vpop.permute.xlu0 %450 }
 0x110   :  { %v234_v19 = vpop.f32.mrf.mxu0  ;;  %v266_v26 = vpop.f32.mrf.mxu1 }
 0x111   :  { %v283_v22 = vmul.f32 10.0, %v234_v19  ;;  %v1768_v25 = vadd.f32 %v1238_v41, %v285_v15  ;;  %v291_v28 = vmul.f32 10.0, %v266_v26  ;;  %v1778_v31 = vadd.f32 %v1238_v41, %v293_v27  ;;  %v1872_v27 = vld [vmem:[%s2579_s2] ss:$0 sm:$0xff] }
 0x112   :  { %vm499_vm1 = vcmp.eq.f32.partialorder %v1814_v52, %v1872_v27  ;;  %vm497_vm3 = vcmp.eq.f32.partialorder %v1810_v50, %v1872_v27  ;;  %vm504_vm10 = vcmp.eq.f32.partialorder %v1818_v54, %v1872_v27 }
 0x113   :  { %351 = vmax.xlane.f32.xlu1 %v1754_v5  ;;  %335 = vmax.xlane.f32.xlu0 %v1756_v11  ;;  %v1774_v30 = vadd.f32 %v1238_v41, %v283_v22  ;;  %v1780_v32 = vadd.f32 %v1238_v41, %v291_v28  ;;  %v1796_v41 = vpop.permute.xlu1 %420  ;;  %v1822_v58 = vpop.permute.xlu0 %480 }
 0x114   :  { %vm498_vm6 = vcmp.eq.f32.partialorder %v1796_v41, %v1872_v27  ;;  %vm510_vm15 = vcmp.eq.f32.partialorder %v1822_v58, %v1872_v27 }
 0x117   :  { %361 = vmax.xlane.f32.xlu1 %v1760_v17  ;;  %345 = vmax.xlane.f32.xlu0 %v1762_v18  ;;  %v1798_v42 = vpop.permute.xlu1 %430 }
 0x118   :  { %vm500_vm5 = vcmp.eq.f32.partialorder %v1798_v42, %v1872_v27 }
 0x11b   :  { %341 = vmax.xlane.f32.xlu0 %v1766_v24  ;;  %347 = vmax.xlane.f32.xlu1 %v1768_v25  ;;  %v1800_v43 = vpop.permute.xlu1 %435 }
 0x11c   :  { %vm501_vm9 = vcmp.eq.f32.partialorder %v1800_v43, %v1872_v27 }
 0x11f   :  { %357 = vmax.xlane.f32.xlu0 %v1772_v29  ;;  %343 = vmax.xlane.f32.xlu1 %v1774_v30  ;;  %v1802_v44 = vpop.permute.xlu1 %440 }
 0x120   :  { %vm502_vm11 = vcmp.eq.f32.partialorder %v1802_v44, %v1872_v27 }
 0x123   :  { %363 = vmax.xlane.f32.xlu0 %v1778_v31  ;;  %359 = vmax.xlane.f32.xlu1 %v1780_v32  ;;  %v1804_v45 = vpop.permute.xlu1 %445 }
 0x124   :  { %vm503_vm8 = vcmp.eq.f32.partialorder %v1804_v45, %v1872_v27 }
 0x127   :  { %v1806_v46 = vpop.permute.xlu1 %455 }
 0x128   :  { %vm505_vm4 = vcmp.eq.f32.partialorder %v1806_v46, %v1872_v27 }
 0x12b   :  { %v1808_v49 = vpop.permute.xlu1 %460 }
 0x12c   :  { %vm506_vm7 = vcmp.eq.f32.partialorder %v1808_v49, %v1872_v27  ;;  %v2287_v49 = vld [vmem:[%s2578_s1 + $0x38] sm:$0xff] }
 0x12f   :  { %v1812_v51 = vpop.permute.xlu1 %465 }
 0x130   :  { %vm507_vm2 = vcmp.eq.f32.partialorder %v1812_v51, %v1872_v27 }
 0x133   :  { %v1816_v53 = vpop.permute.xlu1 %470 }
 0x134   :  { %485 = vperm.xlu1 %1340, %v1787_v39   ;;  %vm508_vm12 = vcmp.eq.f32.partialorder %v1816_v53, %v1872_v27 }
 0x137   :  { %v1820_v57 = vpop.permute.xlu1 %475 }
 0x138   :  { %vm509_vm13 = vcmp.eq.f32.partialorder %v1820_v57, %v1872_v27 }
 0x139   :  { %490 = vperm.xlu0 %1339, %v1793_v40  }
 0x190   :  { %v1824_v59 = vpop.xlane.xlu0 %353  ;;  %v1826_v60 = vpop.xlane.xlu1 %337 }
 0x191   :  { %2615 = vst [vmem:[#allocation4_spill] sm:$0xff] %v1824_v59  ;;  %2616 = vst [vmem:[#allocation5_spill] sm:$0xff] %v1826_v60  ;;  %v1830_v61 = vsub.f32 %v1736_v47, %v1824_v59  ;;  %v1834_v62 = vsub.f32 %v1738_v48, %v1826_v60 }
 0x193   :  { %2617 = vst [vmem:[#allocation6_spill] sm:$0xff] %v1830_v61  ;;  %v385_v1 = vmul.f32 1.442695, %v1834_v62  ;;  %v401_v2 = vmul.f32 1.442695, %v1830_v61  ;;  %v803_v61 = vunpack.c.l.bf16 %v1694_v33 }
 0x194   :  { %v1838_v3 = vpop.xlane.xlu0 %333  ;;  %v1840_v4 = vpop.xlane.xlu1 %339 }
 0x195   :  { %2618 = vst [vmem:[#allocation7_spill] sm:$0xff] %v1838_v3  ;;  %2619 = vst [vmem:[#allocation8_spill] sm:$0xff] %v1840_v4  ;;  %1367 = vpow2.f32 %v385_v1  ;;  %v1844_v12 = vsub.f32 %v1742_v55, %v1838_v3  ;;  %v1858_v22 = vsub.f32 %v1744_v56, %v1840_v4 }
 0x196   :  { %1369 = vpow2.f32 %v401_v2 }
 0x197   :  { %v381_v19 = vmul.f32 1.442695, %v1844_v12  ;;  %v387_v26 = vmul.f32 1.442695, %v1858_v22 }
 0x198   :  { %v1846_v47 = vpop.xlane.xlu0 %349  ;;  %v1852_v15 = vpop.xlane.xlu1 %355 }
 0x199   :  { %2620 = vst [vmem:[#allocation9_spill] sm:$0xff] %v1846_v47  ;;  %v1850_v48 = vsub.f32 %v1748_v63, %v1846_v47  ;;  %2622 = vst [vmem:[#allocation11_spill] sm:$0xff] %v1852_v15 }
 0x19b   :  { %2621 = vst [vmem:[#allocation10_spill] sm:$0xff] %v1850_v48  ;;  %v397_v21 = vmul.f32 1.442695, %v1850_v48 }
 0x19c   :  { %v1860_v55 = vpop.xlane.xlu0 %335  ;;  %v1862_v23 = vpop.xlane.xlu1 %351 }
 0x19d   :  { %1371 = vpow2.f32 %v397_v21  ;;  %2623 = vst [vmem:[#allocation12_spill] sm:$0xff] %v1860_v55  ;;  %2624 = vst [vmem:[#allocation13_spill] sm:$0xff] %v1862_v23  ;;  %v1867_v63 = vsub.f32 %v1756_v11, %v1860_v55  ;;  %v1882_v1 = vsub.f32 %v1754_v5, %v1862_v23 }
 0x19e   :  { %1373 = vpow2.f32 %v381_v19 }
 0x19f   :  { %1375 = vpow2.f32 %v387_v26  ;;  %v383_v11 = vmul.f32 1.442695, %v1867_v63  ;;  %v399_v5 = vmul.f32 1.442695, %v1882_v1 }
 0x1a0   :  { %v1878_v56 = vpop.xlane.xlu0 %345  ;;  %v1892_v21 = vpop.xlane.xlu1 %361 }
 0x1a1   :  { %2625 = vst [vmem:[#allocation14_spill] sm:$0xff] %v1878_v56  ;;  %2626 = vst [vmem:[#allocation15_spill] sm:$0xff] %v1892_v21  ;;  %1377 = vpow2.f32 %v383_v11  ;;  %v1899_v26 = vsub.f32 %v1762_v18, %v1878_v56 }
 0x1a2   :  { %v1874_v28 = vpop.eup %1367  ;;  %1379 = vpow2.f32 %v399_v5 }
 0x1a3   :  { %517 = vadd.xlane.f32.xlu0 %v1874_v28  ;;  %v547_v2 = vsel %vm499_vm1, %v1874_v28, 0.0  ;;  %v1890_v19 = vpop.eup %1369  ;;  %v393_v18 = vmul.f32 1.442695, %v1899_v26 }
 0x1a4   :  { %565 = vadd.xlane.f32.xlu1 %v547_v2  ;;  %v555_v59 = vsel %vm507_vm2, %v1890_v19, 0.0  ;;  %v1906_v47 = vpop.xlane.xlu0 %341  ;;  %v1910_v23 = vpop.xlane.xlu1 %347 }
 0x1a5   :  { %2627 = vst [vmem:[#allocation16_spill] sm:$0xff] %v1906_v47  ;;  %2628 = vst [vmem:[#allocation17_spill] sm:$0xff] %v1910_v23  ;;  %v1917_v11 = vsub.f32 %v1766_v24, %v1906_v47  ;;  %1381 = vpow2.f32 %v393_v18  ;;  %v1932_v24 = vsub.f32 %v1768_v25, %v1910_v23 }
 0x1a7   :  { %533 = vadd.xlane.f32.xlu0 %v1890_v19  ;;  %2629 = vst [vmem:[#allocation18_spill] sm:$0xff] %v1917_v11  ;;  %v389_v5 = vmul.f32 1.442695, %v1917_v11  ;;  %2630 = vst [vmem:[#allocation19_spill] sm:$0xff] %v1932_v24  ;;  %v395_v18 = vmul.f32 1.442695, %v1932_v24  ;;  %v807_v11 = vunpack.c.l.bf16 %v1722_v37 }
 0x1a8   :  { %581 = vadd.xlane.f32.xlu1 %v555_v59  ;;  %v1940_v55 = vpop.xlane.xlu1 %343 }
 0x1a9   :  { %2631 = vst [vmem:[#allocation20_spill] sm:$0xff] %v1940_v55  ;;  %1383 = vpow2.f32 %v389_v5  ;;  %v1947_v25 = vsub.f32 %v1774_v30, %v1940_v55 }
 0x1aa   :  { %v1908_v2 = vpop.eup %1371  ;;  %1385 = vpow2.f32 %v395_v18 }
 0x1ab   :  { %v1912_v4 = vpop.eup %1373  ;;  %529 = vadd.xlane.f32.xlu0 %v1908_v2  ;;  %v553_v56 = vsel %vm505_vm4, %v1908_v2, 0.0  ;;  %2632 = vst [vmem:[#allocation21_spill] sm:$0xff] %v1947_v25  ;;  %v391_v30 = vmul.f32 1.442695, %v1947_v25 }
 0x1ac   :  { %513 = vadd.xlane.f32.xlu1 %v1912_v4  ;;  %v545_v59 = vsel %vm497_vm3, %v1912_v4, 0.0  ;;  %v1938_v47 = vpop.eup %1375 }
 0x1ad   :  { %1387 = vpow2.f32 %v391_v30 }
 0x1ae   :  { %v1954_v23 = vpop.eup %1377 }
 0x1af   :  { %561 = vadd.xlane.f32.xlu0 %v545_v59  ;;  %v548_v59 = vsel %vm500_vm5, %v1938_v47, 0.0  ;;  %v546_v5 = vsel %vm498_vm6, %v1954_v23, 0.0  ;;  %v1968_v55 = vpop.eup %1379 }
 0x1b0   :  { %577 = vadd.xlane.f32.xlu1 %v553_v56  ;;  %v1960_v56 = vsub.f32 %v1750_v0, %v1852_v15  ;;  %v554_v15 = vsel %vm506_vm7, %v1968_v55, 0.0 }
 0x1b2   :  { %2633 = vst [vmem:[#allocation22_spill] sm:$0xff] %v1960_v56  ;;  %v403_v0 = vmul.f32 1.442695, %v1960_v56  ;;  %v1984_v60 = vpop.eup %1381 }
 0x1b3   :  { %519 = vadd.xlane.f32.xlu0 %v1938_v47 }
 0x1b4   :  { %567 = vadd.xlane.f32.xlu1 %v548_v59  ;;  %v1970_v59 = vpop.xlane.xlu0 %357  ;;  %1389 = vpow2.f32 %v403_v0 }
 0x1b5   :  { %2634 = vst [vmem:[#allocation23_spill] sm:$0xff] %v1970_v59  ;;  %v1977_v18 = vsub.f32 %v1772_v29, %v1970_v59  ;;  %v1992_v29 = vsub.f32 %v1760_v17, %v1892_v21  ;;  %v551_v59 = vsel %vm503_vm8, %v1984_v60, 0.0 }
 0x1b7   :  { %515 = vadd.xlane.f32.xlu0 %v1954_v23  ;;  %2635 = vst [vmem:[#allocation24_spill] sm:$0xff] %v1977_v18  ;;  %2637 = vst [vmem:[#allocation26_spill] sm:$0xff] %v1992_v29  ;;  %v405_v30 = vmul.f32 1.442695, %v1977_v18  ;;  %v409_v17 = vmul.f32 1.442695, %v1992_v29  ;;  %v802_v29 = vunpack.c.h.bf16 %v1584_v6 }
 0x1b8   :  { %563 = vadd.xlane.f32.xlu1 %v546_v5  ;;  %v1988_v5 = vpop.xlane.xlu1 %359 }
 0x1b9   :  { %2636 = vst [vmem:[#allocation25_spill] sm:$0xff] %v1988_v5  ;;  %v2004_v3 = vsub.f32 %v1780_v32, %v1988_v5  ;;  %1391 = vpow2.f32 %v405_v30  ;;  %v818_v48 = vmul.f32 %v802_v29, %v802_v29 }
 0x1ba   :  { %1393 = vpow2.f32 %v409_v17 }
 0x1bb   :  { %531 = vadd.xlane.f32.xlu0 %v1968_v55  ;;  %2638 = vst [vmem:[#allocation27_spill] sm:$0xff] %v2004_v3  ;;  %v407_v32 = vmul.f32 1.442695, %v2004_v3  ;;  %v836_v29 = vsel %vm132_vm0, %v818_v48, 0.0  ;;  %v823_v48 = vmul.f32 %v807_v11, %v807_v11 }
 0x1bc   :  { %579 = vadd.xlane.f32.xlu1 %v554_v15  ;;  %v2000_v15 = vpop.eup %1383 }
 0x1bd   :  { %v549_v0 = vsel %vm501_vm9, %v2000_v15, 0.0  ;;  %v2014_v21 = vpop.eup %1385  ;;  %1395 = vpow2.f32 %v407_v32 }
 0x1be   :  { %v552_v5 = vsel %vm504_vm10, %v2014_v21, 0.0  ;;  %v2030_v40 = vpop.eup %1387  ;;  %v2656_v51 = vld [vmem:[#allocation26_spill] sm:$0xff] }
 0x1bf   :  { %525 = vadd.xlane.f32.xlu0 %v1984_v60 }
 0x1c0   :  { %573 = vadd.xlane.f32.xlu1 %v551_v59  ;;  %v2016_v59 = vpop.xlane.xlu0 %363 }
 0x1c1   :  { %2639 = vst [vmem:[#allocation28_spill] sm:$0xff] %v2016_v59  ;;  %v2023_v30 = vsub.f32 %v1778_v31, %v2016_v59  ;;  %v550_v31 = vsel %vm502_vm11, %v2030_v40, 0.0  ;;  %v2051_v59 = vpop.permute.xlu1 %485 }
 0x1c2   :  { %vm2605_vm14 = vcmp.eq.f32.partialorder %v2051_v59, %v1872_v27 }
 0x1c3   :  { %521 = vadd.xlane.f32.xlu0 %v2000_v15  ;;  %2640 = vst [vmem:[#allocation29_spill] sm:$0xff] %v2023_v30  ;;  %v411_v17 = vmul.f32 1.442695, %v2023_v30  ;;  %v801_v30 = vunpack.c.l.bf16 %v1584_v6  ;;  %v804_v6 = vunpack.c.h.bf16 %v1694_v33  ;;  %v806_v33 = vunpack.c.h.bf16 %v1704_v35 }
 0x1c4   :  { %569 = vadd.xlane.f32.xlu1 %v549_v0  ;;  %v2040_v0 = vpop.eup %1389  ;;  %v2075_v3 = vpop.permute.xlu0 %490 }
 0x1c5   :  { %1397 = vpow2.f32 %v411_v17  ;;  %v820_v25 = vmul.f32 %v804_v6, %v804_v6  ;;  %v809_v6 = vunpack.c.l.bf16 %v1589_v7 }
 0x1c6   :  { %v2049_v32 = vpop.eup %1391 }
 0x1c7   :  { %527 = vadd.xlane.f32.xlu0 %v2014_v21  ;;  %v557_v17 = vsel %vm509_vm13, %v2049_v32, 0.0 }
 0x1c8   :  { %575 = vadd.xlane.f32.xlu1 %v552_v5  ;;  %v556_v5 = vsel %vm508_vm12, %v2040_v0, 0.0 }
 0x1cb   :  { %523 = vadd.xlane.f32.xlu0 %v2030_v40 }
 0x1cc   :  { %571 = vadd.xlane.f32.xlu1 %v550_v31  ;;  %v2060_v31 = vpop.eup %1393 }
 0x1cd   :  { %2641 = vst [vmem:[#allocation30_spill] sm:$0xff] %v2060_v31  ;;  %v2064_v39 = vpop.eup %1395 }
 0x1ce   :  { %2642 = vst [vmem:[#allocation31_spill] sm:$0xff] %v2064_v39 }
 0x1cf   :  { %535 = vadd.xlane.f32.xlu0 %v2040_v0 }
 0x1d0   :  { %583 = vadd.xlane.f32.xlu1 %v556_v5  ;;  %v559_v5 = vsel %vm2605_vm14, %v2060_v31, 0.0  ;;  %vm512_vm14 = vcmp.eq.f32.partialorder %v2075_v3, %v1872_v27 }
 0x1d2   :  { %v2082_v18 = vpop.eup %1397 }
 0x1d3   :  { %537 = vadd.xlane.f32.xlu0 %v2049_v32  ;;  %2643 = vst [vmem:[#allocation32_spill] sm:$0xff] %v2082_v18  ;;  %v560_v56 = vsel %vm512_vm14, %v2082_v18, 0.0 }
 0x1d4   :  { %585 = vadd.xlane.f32.xlu1 %v557_v17  ;;  %v558_v17 = vsel %vm510_vm15, %v2064_v39, 0.0 }
 0x1d7   :  { %539 = vadd.xlane.f32.xlu0 %v2064_v39 }
 0x1d8   :  { %589 = vadd.xlane.f32.xlu1 %v559_v5  ;;  %v817_v5 = vmul.f32 %v801_v30, %v801_v30  ;;  %v805_v30 = vunpack.c.l.bf16 %v1704_v35 }
 0x1da   :  { %v833_v24 = vsel %vm132_vm0, %v817_v5, 0.0  ;;  %v808_v5 = vunpack.c.h.bf16 %v1722_v37 }
 0x1db   :  { %541 = vadd.xlane.f32.xlu0 %v2060_v31  ;;  %v821_v31 = vmul.f32 %v805_v30, %v805_v30  ;;  %v851_v30 = vsel %vm132_vm0, %v823_v48, 0.0 }
 0x1dc   :  { %587 = vadd.xlane.f32.xlu1 %v558_v17  ;;  %v819_v17 = vmul.f32 %v803_v61, %v803_v61 }
 0x1dd   :  { %v845_v61 = vsel %vm132_vm0, %v821_v31, 0.0 }
 0x1de   :  { %v839_v39 = vsel %vm132_vm0, %v819_v17, 0.0  ;;  %v810_v17 = vunpack.c.h.bf16 %v1589_v7 }
 0x1df   :  { %543 = vadd.xlane.f32.xlu0 %v2082_v18  ;;  %v842_v18 = vsel %vm132_vm0, %v820_v25, 0.0  ;;  %v825_v25 = vmul.f32 %v809_v6, %v809_v6 }
 0x1e0   :  { %591 = vadd.xlane.f32.xlu1 %v560_v56  ;;  %v822_v56 = vmul.f32 %v806_v33, %v806_v33  ;;  %v813_v33 = vunpack.c.l.bf16 %v1709_v36 }
 0x1e1   :  { %v857_v11 = vsel %vm132_vm0, %v825_v25, 0.0  ;;  %v1544_v25 = vmov 0.0  }
 0x1e2   :  { %v848_v35 = vsel %vm132_vm0, %v822_v56, 0.0  ;;  %v829_v48 = vmul.f32 %v813_v33, %v813_v33  ;;  %v741_v33 = vsel %vm501_vm9, 1.0, %v1544_v25  ;;  %v752_v41 = vsel %vm512_vm14, 1.0, %v1544_v25 }
 0x1e3   :  { %834 = vadd.xlane.f32.xlu0 %v833_v24  ;;  %v824_v24 = vmul.f32 %v808_v5, %v808_v5  ;;  %v814_v5 = vunpack.c.h.bf16 %v1709_v36  ;;  %v816_v36 = vunpack.c.h.bf16 %v1727_v38 }
 0x1e4   :  { %837 = vadd.xlane.f32.xlu1 %v836_v29  ;;  %v811_v29 = vunpack.c.l.bf16 %v1699_v34 }
 0x1e5   :  { %v854_v37 = vsel %vm132_vm0, %v824_v24, 0.0  ;;  %v815_v24 = vunpack.c.l.bf16 %v1727_v38  ;;  %v739_v38 = vsel %vm499_vm1, 1.0, %v1544_v25 }
 0x1e6   :  { %v827_v31 = vmul.f32 %v811_v29, %v811_v29  ;;  %v737_v29 = vsel %vm497_vm3, 1.0, %v1544_v25 }
 0x1e7   :  { %840 = vadd.xlane.f32.xlu0 %v839_v39  ;;  %v826_v39 = vmul.f32 %v810_v17, %v810_v17 }
 0x1e8   :  { %843 = vadd.xlane.f32.xlu1 %v842_v18  ;;  %v812_v18 = vunpack.c.h.bf16 %v1699_v34  ;;  %v830_v34 = vmul.f32 %v814_v5, %v814_v5  ;;  %v744_v5 = vsel %vm504_vm10, 1.0, %v1544_v25 }
 0x1e9   :  { %v860_v7 = vsel %vm132_vm0, %v826_v39, 0.0 }
 0x1ea   :  { %v828_v56 = vmul.f32 %v812_v18, %v812_v18  ;;  %v872_v17 = vsel %vm132_vm0, %v830_v34, 0.0  ;;  %v832_v18 = vmul.f32 %v816_v36, %v816_v36  ;;  %v748_v34 = vsel %vm508_vm12, 1.0, %v1544_v25 }
 0x1eb   :  { %846 = vadd.xlane.f32.xlu0 %v845_v61  ;;  %v863_v61 = vsel %vm132_vm0, %v827_v31, 0.0  ;;  %v740_v31 = vsel %vm500_vm5, 1.0, %v1544_v25 }
 0x1ec   :  { %849 = vadd.xlane.f32.xlu1 %v848_v35  ;;  %v866_v6 = vsel %vm132_vm0, %v828_v56, 0.0  ;;  %v869_v35 = vsel %vm132_vm0, %v829_v48, 0.0  ;;  %v743_v56 = vsel %vm503_vm8, 1.0, %v1544_v25  ;;  %v746_v48 = vsel %vm506_vm7, 1.0, %v1544_v25 }
 0x1ef   :  { %852 = vadd.xlane.f32.xlu0 %v851_v30  ;;  %v831_v30 = vmul.f32 %v815_v24, %v815_v24 }
 0x1f0   :  { %855 = vadd.xlane.f32.xlu1 %v854_v37  ;;  %v738_v37 = vsel %vm498_vm6, 1.0, %v1544_v25 }
 0x1f1   :  { %v875_v39 = vsel %vm132_vm0, %v831_v30, 0.0 }
 0x1f3   :  { %858 = vadd.xlane.f32.xlu0 %v857_v11  ;;  %v878_v11 = vsel %vm132_vm0, %v832_v18, 0.0  ;;  %vm1121_vm0 = vcmask 15368  }
 0x1f4   :  { %861 = vadd.xlane.f32.xlu1 %v860_v7  ;;  %v742_v7 = vsel %vm502_vm11, 1.0, %v1544_v25  ;;  %v1160_v52 = vsel %vm1121_vm0, %v1594_v8, 0.0  ;;  %v1162_v8 = vsel %vm1121_vm0, %v1622_v13, 0.0 }
 0x1f7   :  { %864 = vadd.xlane.f32.xlu0 %v863_v61  ;;  %v745_v61 = vsel %vm505_vm4, 1.0, %v1544_v25 }
 0x1f8   :  { %867 = vadd.xlane.f32.xlu1 %v866_v6  ;;  %v747_v6 = vsel %vm507_vm2, 1.0, %v1544_v25 }
 0x1fb   :  { %870 = vadd.xlane.f32.xlu0 %v869_v35  ;;  %v749_v35 = vsel %vm509_vm13, 1.0, %v1544_v25 }
 0x1fc   :  { %873 = vadd.xlane.f32.xlu1 %v872_v17 }
 0x1ff   :  { %753 = vadd.xlane.f32.xlu0 %v737_v29 }
 0x200   :  { %755 = vadd.xlane.f32.xlu1 %v738_v37 }
 0x203   :  { %876 = vadd.xlane.f32.xlu0 %v875_v39 }
 0x204   :  { %757 = vadd.xlane.f32.xlu1 %v739_v38 }
 0x207   :  { %879 = vadd.xlane.f32.xlu0 %v878_v11 }
 0x208   :  { %759 = vadd.xlane.f32.xlu1 %v740_v31 }
 0x20b   :  { %761 = vadd.xlane.f32.xlu0 %v741_v33 }
 0x20c   :  { %763 = vadd.xlane.f32.xlu1 %v742_v7 }
 0x20f   :  { %765 = vadd.xlane.f32.xlu0 %v743_v56 }
 0x210   :  { %767 = vadd.xlane.f32.xlu1 %v744_v5 }
 0x213   :  { %769 = vadd.xlane.f32.xlu0 %v745_v61 }
 0x214   :  { %771 = vadd.xlane.f32.xlu1 %v746_v48 }
 0x218   :  { %773 = vadd.xlane.f32.xlu1 %v747_v6 }
 0x21c   :  { %775 = vadd.xlane.f32.xlu1 %v748_v34 }
 0x220   :  { %777 = vadd.xlane.f32.xlu1 %v749_v35 }
 0x22c   :  { %v518_v24 = vpop.xlane.xlu0 %517 }
 0x22d   :  { %v566_v17 = vpop.xlane.xlu1 %565 }
 0x22e   :  { %v2173_v30 = vsub.f32 %v518_v24, %v566_v17 }
 0x230   :  { %v611_v36 = vadd.f32 %v1874_v28, %v2173_v30  ;;  %v2177_v29 = vpop.xlane.xlu0 %533 }
 0x231   :  { %v2179_v37 = vpop.xlane.xlu1 %581 }
 0x232   :  { %v627_v39 = vmax.f32 %v611_v36, 1e-37  ;;  %v2230_v50 = vsub.f32 %v2177_v29, %v2179_v37  ;;  %v1166_v29 = vsel %vm1121_vm0, %v1627_v14, 0.0 }
 0x234   :  { %1399 = vlog2.f32 %v627_v39  ;;  %v530_v18 = vpop.xlane.xlu0 %529 }
 0x235   :  { %v514_v38 = vpop.xlane.xlu1 %513 }
 0x238   :  { %v562_v11 = vpop.xlane.xlu0 %561 }
 0x239   :  { %v2181_v31 = vsub.f32 %v514_v38, %v562_v11  ;;  %v578_v33 = vpop.xlane.xlu1 %577 }
 0x23b   :  { %v609_v7 = vadd.f32 %v1912_v4, %v2181_v31 }
 0x23c   :  { %v520_v56 = vpop.xlane.xlu0 %519 }
 0x23d   :  { %v625_v5 = vmax.f32 %v609_v7, 1e-37  ;;  %v568_v61 = vpop.xlane.xlu1 %567 }
 0x23e   :  { %v2185_v48 = vsub.f32 %v520_v56, %v568_v61 }
 0x23f   :  { %1401 = vlog2.f32 %v625_v5 }
 0x240   :  { %v612_v28 = vadd.f32 %v1938_v47, %v2185_v48  ;;  %v516_v6 = vpop.xlane.xlu0 %515 }
 0x241   :  { %v1400_v34 = vpop.eup %1399  ;;  %v564_v35 = vpop.xlane.xlu1 %563 }
 0x242   :  { %v628_v24 = vmax.f32 %v612_v28, 1e-37  ;;  %v2189_v17 = vsub.f32 %v516_v6, %v564_v35  ;;  %v646_v36 = vmul.f32 0.6931472, %v1400_v34 }
 0x244   :  { %1403 = vlog2.f32 %v628_v24  ;;  %v610_v4 = vadd.f32 %v1954_v23, %v2189_v17  ;;  %v532_v39 = vpop.xlane.xlu0 %531  ;;  %v675_v38 = vsub.f32 %v1834_v62, %v646_v36  ;;  %v1159_v24 = vsel %vm1121_vm0, %v1606_v9, 0.0 }
 0x245   :  { %v580_v11 = vpop.xlane.xlu1 %579 }
 0x246   :  { %v626_v7 = vmax.f32 %v610_v4, 1e-37  ;;  %v2194_v56 = vsub.f32 %v532_v39, %v580_v11  ;;  %v691_v47 = vsel %vm499_vm1, %v675_v38, 0.0  ;;  %v1161_v11 = vadd.f32 %v1160_v52, %v1159_v24 }
 0x247   :  { %709 = vadd.xlane.f32.xlu0 %v691_v47  ;;  %vm2644_vm1 = vcmp.eq.f32.partialorder %v2051_v59, %v1872_v27 }
 0x248   :  { %1405 = vlog2.f32 %v626_v7  ;;  %v618_v5 = vadd.f32 %v1968_v55, %v2194_v56  ;;  %v526_v61 = vpop.xlane.xlu0 %525 }
 0x249   :  { %v574_v28 = vpop.xlane.xlu1 %573 }
 0x24a   :  { %v634_v6 = vmax.f32 %v618_v5, 1e-37  ;;  %v2201_v23 = vsub.f32 %v526_v61, %v574_v28  ;;  %v2216_v5 = vsub.f32 %v530_v18, %v578_v33  ;;  %v1164_v33 = vsel %vm1121_vm0, %v1611_v10, 0.0 }
 0x24c   :  { %v1402_v34 = vpop.eup %1401  ;;  %1407 = vlog2.f32 %v634_v6  ;;  %v615_v62 = vadd.f32 %v1984_v60, %v2201_v23  ;;  %v522_v35 = vpop.xlane.xlu0 %521 }
 0x24d   :  { %v570_v36 = vpop.xlane.xlu1 %569  ;;  %v642_v55 = vmul.f32 0.6931472, %v1402_v34  ;;  %v1163_v34 = vadd.f32 %v1162_v8, %v1161_v11  ;;  %v619_v11 = vadd.f32 %v1890_v19, %v2230_v50  ;;  %v1168_v19 = vsel %vm1121_vm0, %v1639_v16, 0.0 }
 0x24e   :  { %v631_v4 = vmax.f32 %v615_v62, 1e-37  ;;  %v2209_v39 = vsub.f32 %v522_v35, %v570_v36  ;;  %v617_v35 = vadd.f32 %v1908_v2, %v2216_v5 }
 0x24f   :  { %v673_v38 = vsub.f32 %v1844_v12, %v642_v55  ;;  %v1165_v2 = vadd.f32 %v1164_v33, %v1163_v34 }
 0x250   :  { %1409 = vlog2.f32 %v631_v4  ;;  %v613_v7 = vadd.f32 %v2000_v15, %v2209_v39  ;;  %v528_v60 = vpop.xlane.xlu0 %527 }
 0x251   :  { %v1404_v47 = vpop.eup %1403  ;;  %v576_v9 = vpop.xlane.xlu1 %575  ;;  %v689_v61 = vsel %vm497_vm3, %v673_v38, 0.0 }
 0x252   :  { %v629_v28 = vmax.f32 %v613_v7, 1e-37  ;;  %v2221_v6 = vsub.f32 %v528_v60, %v576_v9  ;;  %705 = vadd.xlane.f32.xlu1 %v689_v61  ;;  %v648_v12 = vmul.f32 0.6931472, %v1404_v47  ;;  %v633_v7 = vmax.f32 %v617_v35, 1e-37 }
 0x253   :  { %v751_v60 = vsel %vm2644_vm1, 1.0, %v1544_v25 }
 0x254   :  { %1411 = vlog2.f32 %v629_v28  ;;  %v616_v15 = vadd.f32 %v2014_v21, %v2221_v6  ;;  %v524_v62 = vpop.xlane.xlu0 %523  ;;  %v676_v13 = vsub.f32 %v1858_v22, %v648_v12  ;;  %v750_v21 = vsel %vm510_vm15, 1.0, %v1544_v25 }
 0x255   :  { %v1406_v18 = vpop.eup %1405  ;;  %v572_v52 = vpop.xlane.xlu1 %571  ;;  %v1167_v28 = vadd.f32 %v1166_v29, %v1165_v2 }
 0x256   :  { %v632_v24 = vmax.f32 %v616_v15, 1e-37  ;;  %v2238_v36 = vsub.f32 %v524_v62, %v572_v52  ;;  %779 = vadd.xlane.f32.xlu1 %v750_v21  ;;  %v692_v10 = vsel %vm500_vm5, %v676_v13, 0.0  ;;  %v644_v22 = vmul.f32 0.6931472, %v1406_v18 }
 0x257   :  { %711 = vadd.xlane.f32.xlu0 %v692_v10  ;;  %v635_v15 = vmax.f32 %v619_v11, 1e-37  ;;  %v1170_v52 = vsel %vm1121_vm0, %v1652_v20, 0.0  ;;  %v1169_v25 = vadd.f32 %v1168_v19, %v1167_v28  ;;  %v2646_v11 = vld [vmem:[#allocation30_spill] sm:$0xff] }
 0x258   :  { %v614_v37 = vadd.f32 %v2030_v40, %v2238_v36  ;;  %v536_v55 = vpop.xlane.xlu0 %535  ;;  %v674_v4 = vsub.f32 %v1867_v63, %v644_v22  ;;  %1413 = vlog2.f32 %v632_v24  ;;  %v2645_v22 = vld [vmem:[#allocation18_spill] sm:$0xff] }
 0x259   :  { %v1408_v38 = vpop.eup %1407  ;;  %v584_v42 = vpop.xlane.xlu1 %583  ;;  %v1171_v2 = vadd.f32 %v1170_v52, %v1169_v25 }
 0x25a   :  { %v630_v14 = vmax.f32 %v614_v37, 1e-37  ;;  %v2254_v47 = vsub.f32 %v536_v55, %v584_v42  ;;  %781 = vadd.xlane.f32.xlu1 %v751_v60  ;;  %v690_v40 = vsel %vm498_vm6, %v674_v4, 0.0  ;;  %v660_v63 = vmul.f32 0.6931472, %v1408_v38  ;;  %v2647_v42 = vld [vmem:[#allocation31_spill] sm:$0xff] }
 0x25b   :  { %707 = vadd.xlane.f32.xlu0 %v690_v40  ;;  %v1172_v4 = vsel %vm1121_vm0, %v2287_v49, 0.0 }
 0x25c   :  { %1415 = vlog2.f32 %v630_v14  ;;  %v620_v8 = vadd.f32 %v2040_v0, %v2254_v47  ;;  %v538_v9 = vpop.xlane.xlu0 %537  ;;  %v682_v34 = vsub.f32 %v1882_v1, %v660_v63  ;;  %v2303_v63 = vld [vmem:[%s2578_s1 + $0x40] sm:$0xff] }
 0x25d   :  { %v1410_v61 = vpop.eup %1409  ;;  %1417 = vlog2.f32 %v633_v7  ;;  %v586_v12 = vpop.xlane.xlu1 %585  ;;  %v1174_v19 = vsel %vm1121_vm0, %v2303_v63, 0.0 }
 0x25e   :  { %v636_v62 = vmax.f32 %v620_v8, 1e-37  ;;  %v2268_v13 = vsub.f32 %v538_v9, %v586_v12  ;;  %783 = vadd.xlane.f32.xlu1 %v752_v41  ;;  %v654_v16 = vmul.f32 0.6931472, %v1410_v61  ;;  %v698_v1 = vsel %vm506_vm7, %v682_v34, 0.0 }
 0x25f   :  { %v1173_v8 = vadd.f32 %v1172_v4, %v1171_v2  ;;  %v2327_v2 = vld [vmem:[%s2578_s1 + $0x50] sm:$0xff] }
 0x260   :  { %1419 = vlog2.f32 %v636_v62  ;;  %v621_v0 = vadd.f32 %v2049_v32, %v2268_v13  ;;  %v540_v18 = vpop.xlane.xlu0 %539  ;;  %v679_v33 = vsub.f32 %v1899_v26, %v654_v16  ;;  %v2649_v16 = vld [vmem:[#allocation21_spill] sm:$0xff] }
 0x261   :  { %v1412_v35 = vpop.eup %1411  ;;  %v590_v21 = vpop.xlane.xlu1 %589  ;;  %1421 = vlog2.f32 %v635_v15  ;;  %v2648_v15 = vld [vmem:[#allocation32_spill] sm:$0xff]  ;;  %v1175_v52 = vadd.f32 %v1174_v19, %v1173_v8 }
 0x262   :  { %v637_v24 = vmax.f32 %v621_v0, 1e-37  ;;  %723 = vadd.xlane.f32.xlu1 %v698_v1  ;;  %v695_v32 = vsel %vm503_vm8, %v679_v33, 0.0  ;;  %v650_v10 = vmul.f32 0.6931472, %v1412_v35  ;;  %v2315_v33 = vld [vmem:[%s2578_s1 + $0x48] sm:$0xff] }
 0x263   :  { %717 = vadd.xlane.f32.xlu0 %v695_v32  ;;  %v1176_v35 = vsel %vm1121_vm0, %v2315_v33, 0.0 }
 0x264   :  { %v542_v26 = vpop.xlane.xlu0 %541  ;;  %v677_v29 = vsub.f32 %v2645_v22, %v650_v10  ;;  %1423 = vlog2.f32 %v637_v24  ;;  %v2650_v24 = vld [vmem:[#allocation19_spill] sm:$0xff]  ;;  %v2651_v22 = vld [vmem:[#allocation22_spill] sm:$0xff] }
 0x265   :  { %v2282_v20 = vsub.f32 %v542_v26, %v590_v21  ;;  %v588_v37 = vpop.xlane.xlu1 %587  ;;  %v1414_v55 = vpop.eup %1413 }
 0x266   :  { %v2291_v45 = vsub.f32 %v540_v18, %v588_v37  ;;  %v693_v38 = vsel %vm501_vm9, %v677_v29, 0.0  ;;  %v656_v34 = vmul.f32 0.6931472, %v1414_v55  ;;  %v1178_v37 = vsel %vm1121_vm0, %v2327_v2, 0.0 }
 0x267   :  { %v623_v7 = vadd.f32 %v2646_v11, %v2282_v20  ;;  %713 = vadd.xlane.f32.xlu0 %v693_v38  ;;  %v1177_v55 = vadd.f32 %v1176_v35, %v1175_v52  ;;  %v2652_v38 = vld [vmem:[#allocation10_spill] sm:$0xff] }
 0x268   :  { %v622_v60 = vadd.f32 %v2647_v42, %v2291_v45  ;;  %v544_v14 = vpop.xlane.xlu0 %543  ;;  %v680_v32 = vsub.f32 %v2650_v24, %v656_v34  ;;  %v2654_v34 = vld [vmem:[#allocation24_spill] sm:$0xff] }
 0x269   :  { %v1416_v40 = vpop.eup %1415  ;;  %v639_v43 = vmax.f32 %v623_v7, 1e-37  ;;  %v592_v9 = vpop.xlane.xlu1 %591 }
 0x26a   :  { %v1418_v61 = vpop.eup %1417  ;;  %v638_v28 = vmax.f32 %v622_v60, 1e-37  ;;  %v2307_v12 = vsub.f32 %v544_v14, %v592_v9  ;;  %v652_v41 = vmul.f32 0.6931472, %v1416_v40  ;;  %v696_v44 = vsel %vm504_vm10, %v680_v32, 0.0  ;;  %v2341_v14 = vld [vmem:[%s2578_s1 + $0x58] sm:$0xff] }
 0x26b   :  { %1425 = vlog2.f32 %v639_v43  ;;  %v658_v25 = vmul.f32 0.6931472, %v1418_v61  ;;  %v1179_v60 = vadd.f32 %v1178_v37, %v1177_v55  ;;  %v1180_v54 = vsel %vm1121_vm0, %v2341_v14, 0.0  ;;  %v2653_v40 = vld [vmem:[#allocation6_spill] sm:$0xff] }
 0x26c   :  { %1427 = vlog2.f32 %v638_v28  ;;  %v624_v62 = vadd.f32 %v2648_v15, %v2307_v12  ;;  %v678_v0 = vsub.f32 %v2649_v16, %v652_v41  ;;  %v2352_v61 = vld [vmem:[%s2578_s1 + $0x60] sm:$0xff] }
 0x26d   :  { %v1420_v18 = vpop.eup %1419  ;;  %v681_v11 = vsub.f32 %v2652_v38, %v658_v25  ;;  %v1182_v28 = vsel %vm1121_vm0, %v2352_v61, 0.0  ;;  %v1181_v41 = vadd.f32 %v1180_v54, %v1179_v60  ;;  %v838_v25 = vpop.xlane.xlu1 %837  ;;  %v2659_v55 = vld [vmem:[#allocation2_spill] sm:$0xff] }
 0x26e   :  { %v640_v21 = vmax.f32 %v624_v62, 1e-37  ;;  %v694_v1 = vsel %vm502_vm11, %v678_v0, 0.0  ;;  %v664_v10 = vmul.f32 0.6931472, %v1420_v18  ;;  %v1422_v26 = vpop.eup %1421  ;;  %v2655_v0 = vld [vmem:[#allocation27_spill] sm:$0xff] }
 0x26f   :  { %715 = vadd.xlane.f32.xlu0 %v694_v1  ;;  %v662_v7 = vmul.f32 0.6931472, %v1422_v26  ;;  %v697_v53 = vsel %vm505_vm4, %v681_v11, 0.0  ;;  %v1183_v52 = vadd.f32 %v1182_v28, %v1181_v41  ;;  %v2660_v11 = vld [vmem:[#allocation3_spill] sm:$0xff]  ;;  %v1545_v28 = vmov 1  }
 0x270   :  { %1429 = vlog2.f32 %v640_v21  ;;  %v684_v29 = vsub.f32 %v2651_v22, %v664_v10  ;;  %v2371_v10 = vld [vmem:[%s2578_s1 + $0x68] sm:$0xff]  ;;  %v2657_v22 = vld [vmem:[#allocation29_spill] sm:$0xff]  ;;  %1341 = vset.pattern.permute.xlu0 %v1545_v28  ;;  %1342 = vset.pattern.permute.xlu1 %v1545_v28 }
 0x271   :  { %v1424_v42 = vpop.eup %1423  ;;  %v683_v19 = vsub.f32 %v2653_v40, %v662_v7  ;;  %v1184_v26 = vsel %vm1121_vm0, %v2371_v10, 0.0  ;;  %v1188_v7 = vsel %vm1121_vm0, %v2660_v11, 0.0 }
 0x272   :  { %v700_v4 = vsel %vm508_vm12, %v684_v29, 0.0  ;;  %v666_v8 = vmul.f32 0.6931472, %v1424_v42  ;;  %v1185_v29 = vadd.f32 %v1184_v26, %v1183_v52 }
 0x273   :  { %719 = vadd.xlane.f32.xlu0 %v696_v44  ;;  %727 = vadd.xlane.f32.xlu1 %v700_v4  ;;  %v699_v46 = vsel %vm507_vm2, %v683_v19, 0.0  ;;  %vm2658_vm2 = vmmov %vm2644_vm1  ;;  %v1186_v44 = vsel %vm1121_vm0, %v2659_v55, 0.0  ;;  %v844_v4 = vpop.xlane.xlu1 %843 }
 0x274   :  { %v685_v15 = vsub.f32 %v2654_v34, %v666_v8  ;;  %v1187_v38 = vadd.f32 %v1186_v44, %v1185_v29 }
 0x276   :  { %v701_v21 = vsel %vm509_vm13, %v685_v15, 0.0  ;;  %v1189_v42 = vadd.f32 %v1188_v7, %v1187_v38 }
 0x277   :  { %721 = vadd.xlane.f32.xlu0 %v697_v53  ;;  %v850_v60 = vpop.xlane.xlu1 %849  ;;  %v835_v53 = vpop.xlane.xlu0 %834 }
 0x278   :  { %v1426_v43 = vpop.eup %1425  ;;  %v1190_v54 = vrot.slane %v1189_v42, 4 }
 0x279   :  { %v1428_v9 = vpop.eup %1427  ;;  %v670_v16 = vmul.f32 0.6931472, %v1426_v43 }
 0x27a   :  { %v668_v62 = vmul.f32 0.6931472, %v1428_v9  ;;  %v1191_v40 = vadd.f32 %v1190_v54, %v1189_v42  ;;  %v2665_v42 = vld [vmem:[#allocation16_spill] sm:$0xff] }
 0x27b   :  { %725 = vadd.xlane.f32.xlu0 %v699_v46  ;;  %v687_v24 = vsub.f32 %v2656_v51, %v670_v16  ;;  %v856_v59 = vpop.xlane.xlu1 %855  ;;  %v841_v8 = vpop.xlane.xlu0 %840  ;;  %v2662_v51 = vld [vmem:[#allocation5_spill] sm:$0xff] }
 0x27c   :  { %v686_v18 = vsub.f32 %v2655_v0, %v668_v62  ;;  %v1192_v19 = vrot.slane %v1191_v40, 2  ;;  %v881_v62 = vmul.f32 10.0, %v835_v53  ;;  %v883_v52 = vmul.f32 10.0, %v841_v8  ;;  %v2666_v8 = vld [vmem:[#allocation14_spill] sm:$0xff] }
 0x27d   :  { %v1430_v35 = vpop.eup %1429  ;;  %v703_v58 = vsel %vm2658_vm2, %v687_v24, 0.0 }
 0x27e   :  { %v702_v1 = vsel %vm510_vm15, %v686_v18, 0.0  ;;  %v672_v32 = vmul.f32 0.6931472, %v1430_v35  ;;  %v1193_v27 = vadd.f32 %v1192_v19, %v1191_v40  ;;  %v2661_v18 = vld [vmem:[#allocation7_spill] sm:$0xff]  ;;  %v2395_v24 = vsub.f32 %v883_v52, %v2662_v51 }
 0x27f   :  { %729 = vadd.xlane.f32.xlu0 %v701_v21  ;;  %731 = vadd.xlane.f32.xlu1 %v702_v1  ;;  %v862_v3 = vpop.xlane.xlu1 %861  ;;  %v847_v43 = vpop.xlane.xlu0 %846  ;;  %v2391_v35 = vsub.f32 %v881_v62, %v2661_v18  ;;  %v882_v21 = vmul.f32 10.0, %v838_v25  ;;  %v886_v19 = vmul.f32 10.0, %v850_v60  ;;  %v2667_v62 = vld [vmem:[#allocation20_spill] sm:$0xff] }
 0x280   :  { %v688_v57 = vsub.f32 %v2657_v22, %v672_v32  ;;  %v1194_v41 = vrot.slane %v1193_v27, 1  ;;  %v884_v32 = vmul.f32 10.0, %v844_v4  ;;  %v885_v11 = vmul.f32 10.0, %v847_v43 }
 0x281   :  { %v913_v1 = vmul.f32 1.442695, %v2391_v35  ;;  %v2420_v18 = vsub.f32 %v886_v19, %v2667_v62 }
 0x282   :  { %v704_v37 = vsel %vm512_vm14, %v688_v57, 0.0  ;;  %v1195_v46 = vadd.f32 %v1194_v41, %v1193_v27  ;;  %v2663_v57 = vld [vmem:[#allocation12_spill] sm:$0xff]  ;;  %v2411_v54 = vsub.f32 %v885_v11, %v2665_v42 }
 0x283   :  { %733 = vadd.xlane.f32.xlu0 %v703_v58  ;;  %735 = vadd.xlane.f32.xlu1 %v704_v37  ;;  %v868_v9 = vpop.xlane.xlu1 %867  ;;  %v853_v34 = vpop.xlane.xlu0 %852  ;;  %v2400_v29 = vsub.f32 %v882_v21, %v2663_v57  ;;  %1431 = vpow2.f32 %v913_v1  ;;  %v917_v58 = vmul.f32 1.442695, %v2395_v24  ;;  %v2664_v37 = vld [vmem:[#allocation8_spill] sm:$0xff] }
 0x284   :  { %v2404_v55 = vsub.f32 %v884_v32, %v2664_v37  ;;  %v887_v7 = vmul.f32 10.0, %v853_v34  ;;  %v921_v41 = vmul.f32 1.442695, %v2411_v54  ;;  %v888_v34 = vmul.f32 10.0, %v856_v59  ;;  %v2668_v32 = vld [vmem:[#allocation13_spill] sm:$0xff] }
 0x285   :  { %v915_v25 = vmul.f32 1.442695, %v2400_v29  ;;  %1433 = vpow2.f32 %v917_v58  ;;  %v923_v58 = vmul.f32 1.442695, %v2420_v18 }
 0x286   :  { %v919_v4 = vmul.f32 1.442695, %v2404_v55  ;;  %v2416_v27 = vsub.f32 %v887_v7, %v2666_v8 }
 0x287   :  { %v2386_v15 = vpop.xlane.xlu1 %873  ;;  %v859_v16 = vpop.xlane.xlu0 %858  ;;  %1435 = vpow2.f32 %v915_v25 }
 0x288   :  { %1437 = vpow2.f32 %v919_v4  ;;  %v925_v43 = vmul.f32 1.442695, %v2416_v27  ;;  %v889_v52 = vmul.f32 10.0, %v859_v16  ;;  %v2670_v4 = vld [vmem:[#allocation9_spill] sm:$0xff]  ;;  %v892_v16 = vmul.f32 10.0, %v868_v9 }
 0x289   :  { %1439 = vpow2.f32 %v921_v41 }
 0x28a   :  { %1441 = vpow2.f32 %v925_v43  ;;  %v2434_v59 = vsub.f32 %v889_v52, %v2670_v4  ;;  %v2671_v43 = vld [vmem:[#allocation11_spill] sm:$0xff] }
 0x28b   :  { %v2388_v0 = vpop.xlane.xlu1 %755  ;;  %v865_v26 = vpop.xlane.xlu0 %864  ;;  %1443 = vpow2.f32 %v923_v58 }
 0x28c   :  { %v891_v62 = vmul.f32 10.0, %v865_v26 }
 0x28f   :  { %v2397_v22 = vpop.xlane.xlu1 %757  ;;  %v871_v44 = vpop.xlane.xlu0 %870 }
 0x290   :  { %v1432_v28 = vpop.eup %1431  ;;  %v893_v52 = vmul.f32 10.0, %v871_v44 }
 0x291   :  { %v945_v51 = vadd.f32 %v1432_v28, %v2181_v31 }
 0x292   :  { %v1434_v60 = vpop.eup %1433 }
 0x293   :  { %v2407_v38 = vpop.xlane.xlu1 %759  ;;  %v754_v53 = vpop.xlane.xlu0 %753  ;;  %v947_v11 = vadd.f32 %v1434_v60, %v2173_v30  ;;  %v961_v7 = vmax.f32 %v945_v51, 1e-37  ;;  %v894_v51 = vmul.f32 10.0, %v2386_v15 }
 0x294   :  { %1204 = vperm.xlu1 %1342, %v1195_v46   ;;  %v890_v46 = vmul.f32 10.0, %v862_v3  ;;  %v2669_v3 = vld [vmem:[#allocation17_spill] sm:$0xff]  ;;  %v1436_v25 = vpop.eup %1435 }
 0x295   :  { %v2431_v37 = vsub.f32 %v888_v34, %v2669_v3  ;;  %v1438_v31 = vpop.eup %1437  ;;  %v946_v41 = vadd.f32 %v1436_v25, %v2189_v17  ;;  %v2444_v34 = vsub.f32 %v892_v16, %v2671_v43  ;;  %v963_v9 = vmax.f32 %v947_v11, 1e-37  ;;  %v2673_v16 = vld [vmem:[#allocation23_spill] sm:$0xff]  ;;  %v2674_v11 = vld [vmem:[#allocation25_spill] sm:$0xff] }
 0x296   :  { %v2427_v57 = vsub.f32 %v890_v46, %v2668_v32  ;;  %v929_v46 = vmul.f32 1.442695, %v2434_v59  ;;  %1445 = vlog2.f32 %v961_v7  ;;  %v948_v30 = vadd.f32 %v1438_v31, %v2185_v48  ;;  %v2672_v32 = vld [vmem:[#allocation4_spill] sm:$0xff]  ;;  %v1440_v44 = vpop.eup %1439 }
 0x297   :  { %v2413_v40 = vpop.xlane.xlu1 %763  ;;  %v877_v21 = vpop.xlane.xlu0 %876  ;;  %v927_v28 = vmul.f32 1.442695, %v2431_v37  ;;  %v962_v60 = vmax.f32 %v946_v41, 1e-37  ;;  %v2449_v58 = vsub.f32 %v891_v62, %v2672_v32  ;;  %v935_v17 = vmul.f32 1.442695, %v2444_v34 }
 0x298   :  { %v931_v42 = vmul.f32 1.442695, %v2427_v57  ;;  %v1240_v25 = vadd.f32 -1.0, %v754_v53  ;;  %v964_v4 = vmax.f32 %v948_v30, 1e-37  ;;  %v2455_v48 = vsub.f32 %v893_v52, %v2673_v16  ;;  %v1442_v15 = vpop.eup %1441 }
 0x299   :  { %v2458_v7 = vsub.f32 %v894_v51, %v2674_v11  ;;  %v933_v31 = vmul.f32 1.442695, %v2449_v58  ;;  %v1242_v53 = vadd.f32 -1.0, %v2397_v22  ;;  %v951_v52 = vadd.f32 %v1442_v15, %v2201_v23  ;;  %v1444_v51 = vpop.eup %1443  ;;  %v2676_v15 = vld [vmem:[#allocation28_spill] sm:$0xff] }
 0x29a   :  { %1447 = vpow2.f32 %v931_v42  ;;  %v1241_v42 = vadd.f32 -1.0, %v2388_v0  ;;  %v1041_v41 = vmax.f32 %v1240_v25, 1.0  ;;  %v2675_v0 = vld [vmem:[#allocation15_spill] sm:$0xff] }
 0x29b   :  { %v2423_v1 = vpop.xlane.xlu1 %767  ;;  %v880_v19 = vpop.xlane.xlu0 %879  ;;  %1449 = vpow2.f32 %v927_v28  ;;  %v895_v28 = vmul.f32 10.0, %v877_v21  ;;  %v939_v30 = vmul.f32 1.442695, %v2458_v7  ;;  %v1043_v22 = vmax.f32 %v1242_v53, 1.0 }
 0x29c   :  { %1451 = vpow2.f32 %v929_v46  ;;  %v937_v46 = vmul.f32 1.442695, %v2455_v48  ;;  %v896_v32 = vmul.f32 10.0, %v880_v19 }
 0x29d   :  { %1453 = vlog2.f32 %v963_v9  ;;  %v949_v9 = vadd.f32 %v1440_v44, %v2209_v39  ;;  %v2470_v21 = vsub.f32 %v895_v28, %v2675_v0  ;;  %v967_v39 = vmax.f32 %v951_v52, 1e-37 }
 0x29e   :  { %1455 = vlog2.f32 %v962_v60  ;;  %v1042_v60 = vmax.f32 %v1241_v42, 1.0  ;;  %v950_v44 = vadd.f32 %v1444_v51, %v2238_v36 }
 0x29f   :  { %v2438_v8 = vpop.xlane.xlu1 %771  ;;  %v762_v26 = vpop.xlane.xlu0 %761  ;;  %1457 = vpow2.f32 %v935_v17  ;;  %v1243_v17 = vadd.f32 -1.0, %v2407_v38  ;;  %v941_v11 = vmul.f32 1.442695, %v2470_v21 }
 0x2a0   :  { %1459 = vlog2.f32 %v964_v4  ;;  %v965_v4 = vmax.f32 %v949_v9, 1e-37  ;;  %v966_v36 = vmax.f32 %v950_v44, 1e-37 }
 0x2a1   :  { %1461 = vpow2.f32 %v933_v31  ;;  %v2476_v31 = vsub.f32 %v896_v32, %v2676_v15  ;;  %v1044_v28 = vmax.f32 %v1243_v17, 1.0 }
 0x2a2   :  { %1463 = vrcp.f32 %v1041_v41 }
 0x2a3   :  { %v2452_v3 = vpop.xlane.xlu1 %773  ;;  %v766_v62 = vpop.xlane.xlu0 %765  ;;  %1465 = vpow2.f32 %v937_v46  ;;  %v943_v52 = vmul.f32 1.442695, %v2476_v31 }
 0x2a4   :  { %v1446_v25 = vpop.eup %1445  ;;  %1467 = vpow2.f32 %v939_v30 }
 0x2a5   :  { %1469 = vrcp.f32 %v1042_v60  ;;  %v978_v41 = vmul.f32 0.6931472, %v1446_v25 }
 0x2a6   :  { %1471 = vrcp.f32 %v1043_v22  ;;  %v1244_v22 = vadd.f32 -1.0, %v762_v26 }
 0x2a7   :  { %v2464_v43 = vpop.xlane.xlu1 %775  ;;  %v1448_v16 = vpop.eup %1447  ;;  %1473 = vlog2.f32 %v965_v4  ;;  %v1009_v25 = vsub.f32 %v2391_v35, %v978_v41  ;;  %v1245_v4 = vadd.f32 -1.0, %v2413_v40 }
 0x2a8   :  { %v1450_v23 = vpop.eup %1449  ;;  %v2478_v19 = vpop.xlane.xlu0 %769  ;;  %v954_v46 = vadd.f32 %v1448_v16, %v2194_v56  ;;  %1475 = vlog2.f32 %v967_v39 }
 0x2a9   :  { %v1452_v38 = vpop.eup %1451  ;;  %v952_v9 = vadd.f32 %v1450_v23, %v2221_v6  ;;  %1477 = vpow2.f32 %v941_v11  ;;  %v1046_v41 = vmax.f32 %v1245_v4, 1.0 }
 0x2aa   :  { %v1454_v53 = vpop.eup %1453  ;;  %v953_v0 = vadd.f32 %v1452_v38, %v2216_v5  ;;  %1479 = vrcp.f32 %v1044_v28  ;;  %v970_v16 = vmax.f32 %v954_v46, 1e-37  ;;  %v1045_v38 = vmax.f32 %v1244_v22, 1.0 }
 0x2ab   :  { %v2480_v42 = vpop.xlane.xlu1 %777  ;;  %v1456_v30 = vpop.eup %1455  ;;  %v982_v17 = vmul.f32 0.6931472, %v1454_v53  ;;  %1481 = vlog2.f32 %v966_v36  ;;  %v968_v44 = vmax.f32 %v952_v9, 1e-37  ;;  %v1246_v28 = vadd.f32 -1.0, %v766_v62 }
 0x2ac   :  { %v1458_v32 = vpop.eup %1457  ;;  %v980_v6 = vmul.f32 0.6931472, %v1456_v30  ;;  %1483 = vpow2.f32 %v943_v52  ;;  %v969_v15 = vmax.f32 %v953_v0, 1e-37 }
 0x2ad   :  { %v1460_v56 = vpop.eup %1459  ;;  %v956_v11 = vadd.f32 %v1458_v32, %v2254_v47  ;;  %v1011_v26 = vsub.f32 %v2395_v24, %v982_v17  ;;  %1485 = vlog2.f32 %v970_v16  ;;  %v1047_v62 = vmax.f32 %v1246_v28, 1.0 }
 0x2ae   :  { %v1462_v5 = vpop.eup %1461  ;;  %v984_v53 = vmul.f32 0.6931472, %v1460_v56  ;;  %v1010_v36 = vsub.f32 %v2400_v29, %v980_v6  ;;  %1487 = vlog2.f32 %v968_v44  ;;  %v1249_v6 = vadd.f32 -1.0, %v2438_v8 }
 0x2af   :  { %v1464_v35 = vpop.eup %1463  ;;  %v972_v52 = vmax.f32 %v956_v11, 1e-37  ;;  %1489 = vlog2.f32 %v969_v15  ;;  %v955_v47 = vadd.f32 %v1462_v5, %v2230_v50 }
 0x2b0   :  { %v1466_v40 = vpop.eup %1465  ;;  %1491 = vrcp.f32 %v1045_v38  ;;  %v1012_v32 = vsub.f32 %v2404_v55, %v984_v53 }
 0x2b1   :  { %v1468_v9 = vpop.eup %1467  ;;  %1493 = vrcp.f32 %v1046_v41  ;;  %v957_v29 = vadd.f32 %v1466_v40, %v2268_v13  ;;  %v971_v44 = vmax.f32 %v955_v47, 1e-37  ;;  %v1535_v41 = vld [vmem:[%s2578_s1 + $0x8] sm:$0xff] }
 0x2b2   :  { %v1470_v0 = vpop.eup %1469  ;;  %1495 = vlog2.f32 %v972_v52  ;;  %v958_v15 = vadd.f32 %v1468_v9, %v2291_v45  ;;  %v1251_v9 = vadd.f32 -1.0, %v2464_v43 }
 0x2b3   :  { %v1472_v17 = vpop.eup %1471  ;;  %1497 = vrcp.f32 %v1047_v62  ;;  %v973_v28 = vmax.f32 %v957_v29, 1e-37  ;;  %v1250_v62 = vadd.f32 -1.0, %v2452_v3 }
 0x2b4   :  { %1499 = vlog2.f32 %v971_v44  ;;  %v974_v47 = vmax.f32 %v958_v15, 1e-37 }
 0x2d0   :  { %v710_v51 = vpop.xlane.xlu0 %709 }
 0x2d1   :  { %v1027_v46 = vsub.f32 %v710_v51, %v1011_v26  ;;  %v1247_v51 = vadd.f32 -1.0, %v2423_v1  ;;  %v1248_v1 = vadd.f32 -1.0, %v2478_v19 }
 0x2d3   :  { %v1062_v56 = vmul.f32 %v1472_v17, %v1027_v46  ;;  %v1048_v38 = vmax.f32 %v1247_v51, 1.0  ;;  %v1050_v46 = vmax.f32 %v1249_v6, 1.0  ;;  %v1536_v17 = vld [vmem:[%s2578_s1 + $0x10] sm:$0xff] }
 0x2d5   :  { %v1091_v26 = vmul.f32 -1.4285715, %v1062_v56  ;;  %1501 = vrcp.f32 %v1048_v38 }
 0x2d6   :  { %1503 = vlog2.f32 %v973_v28 }
 0x2d7   :  { %v1107_v51 = vmul.f32 %v1536_v17, %v1091_v26  ;;  %v1252_v26 = vadd.f32 -1.0, %v2480_v42  ;;  %v1538_v42 = vld [vmem:[%s2578_s1 + $0x20] sm:$0xff] }
 0x2d9   :  { %v1125_v38 = vsel %vm1121_vm0, %v1107_v51, 0.0 }
 0x2db   :  { %v706_v60 = vpop.xlane.xlu1 %705 }
 0x2dc   :  { %v1025_v39 = vsub.f32 %v706_v60, %v1009_v25  ;;  %v1474_v25 = vpop.eup %1473  ;;  %1505 = vrcp.f32 %v1050_v46 }
 0x2dd   :  { %v1476_v50 = vpop.eup %1475  ;;  %v986_v13 = vmul.f32 0.6931472, %v1474_v25  ;;  %1507 = vlog2.f32 %v974_v47 }
 0x2de   :  { %v1058_v60 = vmul.f32 %v1464_v35, %v1025_v39  ;;  %v1478_v11 = vpop.eup %1477  ;;  %v990_v52 = vmul.f32 0.6931472, %v1476_v50 }
 0x2df   :  { %v2492_v24 = vpop.xlane.xlu1 %779  ;;  %v1480_v5 = vpop.eup %1479  ;;  %v959_v19 = vadd.f32 %v1478_v11, %v2282_v20  ;;  %v1051_v11 = vmax.f32 %v1250_v62, 1.0 }
 0x2e0   :  { %v712_v23 = vpop.xlane.xlu0 %711  ;;  %v1089_v4 = vmul.f32 -1.4285715, %v1058_v60  ;;  %v1482_v40 = vpop.eup %1481  ;;  %v1015_v50 = vsub.f32 %v2416_v27, %v990_v52  ;;  %v1053_v52 = vmax.f32 %v1252_v26, 1.0 }
 0x2e1   :  { %v1028_v16 = vsub.f32 %v712_v23, %v1012_v32  ;;  %v1534_v23 = vld [vmem:[%s2578_s1] sm:$0xff]  ;;  %v1013_v32 = vsub.f32 %v2411_v54, %v986_v13  ;;  %v988_v15 = vmul.f32 0.6931472, %v1482_v40 }
 0x2e2   :  { %v1105_v53 = vmul.f32 %v1534_v23, %v1089_v4  ;;  %v975_v4 = vmax.f32 %v959_v19, 1e-37 }
 0x2e3   :  { %v1064_v8 = vmul.f32 %v1480_v5, %v1028_v16  ;;  %v2503_v35 = vpop.xlane.xlu1 %781  ;;  %v1014_v40 = vsub.f32 %v2420_v18, %v988_v15 }
 0x2e4   :  { %v708_v30 = vpop.xlane.xlu0 %707  ;;  %v1122_v20 = vsel %vm1121_vm0, %v1105_v53, 0.0  ;;  %v1254_v18 = vadd.f32 -1.0, %v2503_v35 }
 0x2e5   :  { %v1026_v22 = vsub.f32 %v708_v30, %v1010_v36  ;;  %v1484_v36 = vpop.eup %1483  ;;  %v1092_v29 = vmul.f32 -1.4285715, %v1064_v8  ;;  %v1253_v8 = vadd.f32 -1.0, %v2492_v24 }
 0x2e6   :  { %v960_v16 = vadd.f32 %v1484_v36, %v2307_v12 }
 0x2e7   :  { %v1060_v39 = vmul.f32 %v1470_v0, %v1026_v22  ;;  %v1049_v0 = vmax.f32 %v1248_v1, 1.0  ;;  %v1486_v22 = vpop.eup %1485  ;;  %v784_v54 = vpop.xlane.xlu1 %783  ;;  %v1537_v1 = vld [vmem:[%s2578_s1 + $0x18] sm:$0xff] }
 0x2e8   :  { %v1488_v43 = vpop.eup %1487  ;;  %v1108_v12 = vmul.f32 %v1537_v1, %v1092_v29  ;;  %v976_v23 = vmax.f32 %v960_v16, 1e-37 }
 0x2e9   :  { %v1090_v55 = vmul.f32 -1.4285715, %v1060_v39  ;;  %v1490_v3 = vpop.eup %1489  ;;  %v1052_v39 = vmax.f32 %v1251_v9, 1.0  ;;  %1509 = vrcp.f32 %v1049_v0  ;;  %v992_v46 = vmul.f32 0.6931472, %v1488_v43 }
 0x2ea   :  { %v1492_v44 = vpop.eup %1491  ;;  %1511 = vlog2.f32 %v975_v4  ;;  %v1127_v19 = vsel %vm1121_vm0, %v1108_v12, 0.0  ;;  %v994_v29 = vmul.f32 0.6931472, %v1490_v3 }
 0x2eb   :  { %v1106_v45 = vmul.f32 %v1535_v41, %v1090_v55  ;;  %v996_v55 = vmul.f32 0.6931472, %v1486_v22  ;;  %v1494_v5 = vpop.eup %1493  ;;  %1513 = vrcp.f32 %v1052_v39  ;;  %v724_v36 = vpop.xlane.xlu1 %723  ;;  %v1016_v4 = vsub.f32 %v2431_v37, %v992_v46  ;;  %v1539_v37 = vld [vmem:[%s2578_s1 + $0x30] sm:$0xff] }
 0x2ec   :  { %v718_v60 = vpop.xlane.xlu0 %717  ;;  %v1496_v53 = vpop.eup %1495  ;;  %1515 = vrcp.f32 %v1051_v11  ;;  %v1055_v11 = vmax.f32 %v1254_v18, 1.0  ;;  %v1017_v1 = vsub.f32 %v2434_v59, %v994_v29 }
 0x2ed   :  { %v1123_v30 = vsel %vm1121_vm0, %v1106_v45, 0.0  ;;  %v1031_v13 = vsub.f32 %v718_v60, %v1015_v50  ;;  %v1498_v45 = vpop.eup %1497  ;;  %v1018_v60 = vsub.f32 %v2427_v57, %v996_v55  ;;  %v1000_v0 = vmul.f32 0.6931472, %v1496_v53 }
 0x2ee   :  { %v1124_v25 = vadd.f32 %v1123_v30, %v1122_v20  ;;  %1517 = vlog2.f32 %v976_v23  ;;  %v1500_v62 = vpop.eup %1499  ;;  %v1255_v57 = vadd.f32 -1.0, %v784_v54 }
 0x2ef   :  { %v1070_v9 = vmul.f32 %v1498_v45, %v1031_v13  ;;  %v1034_v51 = vsub.f32 %v724_v36, %v1018_v60  ;;  %v1502_v43 = vpop.eup %1501  ;;  %1519 = vrcp.f32 %v1053_v52  ;;  %v1020_v50 = vsub.f32 %v2444_v34, %v1000_v0  ;;  %v1540_v34 = vld [vmem:[%s2578_s1 + $0x28] sm:$0xff] }
 0x2f0   :  { %v714_v56 = vpop.xlane.xlu0 %713  ;;  %v1126_v27 = vadd.f32 %v1125_v38, %v1124_v25  ;;  %v1504_v16 = vpop.eup %1503  ;;  %v1056_v38 = vmax.f32 %v1255_v57, 1.0 }
 0x2f1   :  { %v1029_v6 = vsub.f32 %v714_v56, %v1013_v32  ;;  %v1054_v32 = vmax.f32 %v1253_v8, 1.0  ;;  %v1095_v25 = vmul.f32 -1.4285715, %v1070_v9  ;;  %v1506_v35 = vpop.eup %1505  ;;  %v1002_v53 = vmul.f32 0.6931472, %v1504_v16 }
 0x2f2   :  { %v1128_v47 = vadd.f32 %v1127_v19, %v1126_v27  ;;  %v1508_v15 = vpop.eup %1507  ;;  %v1076_v3 = vmul.f32 %v1506_v35, %v1034_v51 }
 0x2f3   :  { %v1066_v28 = vmul.f32 %v1492_v44, %v1029_v6  ;;  %v998_v44 = vmul.f32 0.6931472, %v1500_v62  ;;  %1521 = vrcp.f32 %v1054_v32  ;;  %v1111_v12 = vmul.f32 %v1539_v37, %v1095_v25 }
 0x2f4   :  { %1523 = vrcp.f32 %v1055_v11  ;;  %v1098_v46 = vmul.f32 -1.4285715, %v1076_v3  ;;  %v1004_v60 = vmul.f32 0.6931472, %v1508_v15 }
 0x2f5   :  { %v1093_v41 = vmul.f32 -1.4285715, %v1066_v28  ;;  %v1019_v23 = vsub.f32 %v2449_v58, %v998_v44  ;;  %1525 = vrcp.f32 %v1056_v38  ;;  %v1133_v9 = vsel %vm1121_vm0, %v1111_v12, 0.0 }
 0x2f6   :  { %v1114_v18 = vmul.f32 %v2315_v33, %v1098_v46 }
 0x2f7   :  { %v1109_v30 = vmul.f32 %v1538_v42, %v1093_v41 }
 0x2f8   :  { %v716_v24 = vpop.xlane.xlu0 %715  ;;  %v1139_v44 = vsel %vm1121_vm0, %v1114_v18, 0.0 }
 0x2f9   :  { %v1129_v22 = vsel %vm1121_vm0, %v1109_v30, 0.0  ;;  %v1030_v17 = vsub.f32 %v716_v24, %v1014_v40 }
 0x2fa   :  { %v1130_v20 = vadd.f32 %v1129_v22, %v1128_v47 }
 0x2fb   :  { %v1068_v56 = vmul.f32 %v1494_v5, %v1030_v17  ;;  %v1510_v5 = vpop.eup %1509  ;;  %v1021_v17 = vsub.f32 %v2455_v48, %v1002_v53 }
 0x2fc   :  { %v720_v39 = vpop.xlane.xlu0 %719  ;;  %v728_v6 = vpop.xlane.xlu1 %727 }
 0x2fd   :  { %v1094_v55 = vmul.f32 -1.4285715, %v1068_v56  ;;  %v1032_v54 = vsub.f32 %v720_v39, %v1016_v4  ;;  %v1036_v26 = vsub.f32 %v728_v6, %v1020_v50  ;;  %v1512_v8 = vpop.eup %1511 }
 0x2fe   :  { %v1514_v40 = vpop.eup %1513  ;;  %v1006_v57 = vmul.f32 0.6931472, %v1512_v8 }
 0x2ff   :  { %v1110_v13 = vmul.f32 %v1540_v34, %v1094_v55  ;;  %v1072_v28 = vmul.f32 %v1502_v43, %v1032_v54  ;;  %v1516_v36 = vpop.eup %1515  ;;  %v1080_v30 = vmul.f32 %v1514_v40, %v1036_v26  ;;  %v1541_v40 = vld [vmem:[%s2578_s1 + $0x70] sm:$0xff] }
 0x300   :  { %v722_v27 = vpop.xlane.xlu0 %721  ;;  %v1518_v24 = vpop.eup %1517  ;;  %v1023_v35 = vsub.f32 %v2470_v21, %v1006_v57 }
 0x301   :  { %v1131_v59 = vsel %vm1121_vm0, %v1110_v13, 0.0  ;;  %v1096_v41 = vmul.f32 -1.4285715, %v1072_v28  ;;  %v1033_v45 = vsub.f32 %v722_v27, %v1017_v1  ;;  %v1100_v51 = vmul.f32 -1.4285715, %v1080_v30  ;;  %v1520_v4 = vpop.eup %1519 }
 0x302   :  { %v1132_v19 = vadd.f32 %v1131_v59, %v1130_v20  ;;  %v1008_v56 = vmul.f32 0.6931472, %v1518_v24  ;;  %v1522_v33 = vpop.eup %1521 }
 0x303   :  { %v1112_v42 = vmul.f32 %v2287_v49, %v1096_v41  ;;  %v1074_v52 = vmul.f32 %v1510_v5, %v1033_v45  ;;  %v1022_v49 = vsub.f32 %v2458_v7, %v1004_v60  ;;  %v1524_v34 = vpop.eup %1523 }
 0x304   :  { %v1134_v58 = vadd.f32 %v1133_v9, %v1132_v19  ;;  %v726_v47 = vpop.xlane.xlu0 %725  ;;  %v1024_v38 = vsub.f32 %v2476_v31, %v1008_v56  ;;  %v1526_v21 = vpop.eup %1525 }
 0x305   :  { %v1135_v0 = vsel %vm1121_vm0, %v1112_v42, 0.0  ;;  %v1097_v62 = vmul.f32 -1.4285715, %v1074_v52  ;;  %v1035_v32 = vsub.f32 %v726_v47, %v1019_v23 }
 0x306   :  { %v1136_v22 = vadd.f32 %v1135_v0, %v1134_v58 }
 0x307   :  { %v1113_v20 = vmul.f32 %v2303_v63, %v1097_v62  ;;  %v1078_v29 = vmul.f32 %v1516_v36, %v1035_v32  ;;  %v1116_v63 = vmul.f32 %v2341_v14, %v1100_v51 }
 0x308   :  { %v730_v43 = vpop.xlane.xlu0 %729  ;;  %v732_v25 = vpop.xlane.xlu1 %731 }
 0x309   :  { %v1137_v16 = vsel %vm1121_vm0, %v1113_v20, 0.0  ;;  %v1099_v39 = vmul.f32 -1.4285715, %v1078_v29  ;;  %v1037_v50 = vsub.f32 %v730_v43, %v1021_v17  ;;  %v1038_v6 = vsub.f32 %v732_v25, %v1022_v49 }
 0x30a   :  { %v1138_v48 = vadd.f32 %v1137_v16, %v1136_v22  ;;  %v1143_v14 = vsel %vm1121_vm0, %v1116_v63, 0.0 }
 0x30b   :  { %v1115_v11 = vmul.f32 %v2327_v2, %v1099_v39  ;;  %v1082_v7 = vmul.f32 %v1520_v4, %v1037_v50  ;;  %v1084_v55 = vmul.f32 %v1522_v33, %v1038_v6 }
 0x30c   :  { %v1140_v54 = vadd.f32 %v1139_v44, %v1138_v48  ;;  %v734_v15 = vpop.xlane.xlu0 %733  ;;  %v736_v3 = vpop.xlane.xlu1 %735 }
 0x30d   :  { %v1141_v1 = vsel %vm1121_vm0, %v1115_v11, 0.0  ;;  %v1101_v5 = vmul.f32 -1.4285715, %v1082_v7  ;;  %v1102_v37 = vmul.f32 -1.4285715, %v1084_v55  ;;  %v1039_v12 = vsub.f32 %v734_v15, %v1023_v35 }
 0x30e   :  { %v1142_v13 = vadd.f32 %v1141_v1, %v1140_v54  ;;  %v1040_v28 = vsub.f32 %v736_v3, %v1024_v38 }
 0x30f   :  { %v1117_v2 = vmul.f32 %v2352_v61, %v1101_v5  ;;  %v1118_v26 = vmul.f32 %v2371_v10, %v1102_v37  ;;  %v1086_v27 = vmul.f32 %v1524_v34, %v1039_v12  ;;  %v1542_v61 = vld [vmem:[%s2578_s1 + $0x78] sm:$0xff] }
 0x310   :  { %v1144_v23 = vadd.f32 %v1143_v14, %v1142_v13  ;;  %v1088_v53 = vmul.f32 %v1526_v21, %v1040_v28  ;;  %v1205_v0 = vpop.permute.xlu1 %1204 }
 0x311   :  { %v1145_v31 = vsel %vm1121_vm0, %v1117_v2, 0.0  ;;  %v1103_v8 = vmul.f32 -1.4285715, %v1086_v27  ;;  %v1147_v45 = vsel %vm1121_vm0, %v1118_v26, 0.0  ;;  %1207 = vst [vmem:[%s2580_s3 + $0x1] sm:$0x1] %v1205_v0 }
 0x312   :  { %v1146_v59 = vadd.f32 %v1145_v31, %v1144_v23  ;;  %v1104_v41 = vmul.f32 -1.4285715, %v1088_v53 }
 0x313   :  { %v1119_v46 = vmul.f32 %v1541_v40, %v1103_v8 }
 0x314   :  { %v1148_v19 = vadd.f32 %v1147_v45, %v1146_v59  ;;  %v1120_v10 = vmul.f32 %v1542_v61, %v1104_v41 }
 0x315   :  { %v1149_v60 = vsel %vm1121_vm0, %v1119_v46, 0.0 }
 0x316   :  { %v1150_v36 = vadd.f32 %v1149_v60, %v1148_v19  ;;  %v1151_v9 = vsel %vm1121_vm0, %v1120_v10, 0.0 }
 0x318   :  { %v1152_v42 = vadd.f32 %v1151_v9, %v1150_v36 }
 0x31a   :  { %v1153_v30 = vrot.slane %v1152_v42, 4 }
 0x31c   :  { %v1154_v52 = vadd.f32 %v1153_v30, %v1152_v42 }
 0x31e   :  { %v1155_v58 = vrot.slane %v1154_v52, 2 }
 0x320   :  { %v1156_v47 = vadd.f32 %v1155_v58, %v1154_v52 }
 0x322   :  { %v1157_v24 = vrot.slane %v1156_v47, 1 }
 0x324   :  { %v1158_v62 = vadd.f32 %v1157_v24, %v1156_v47 }
 0x326   :  { %1198 = vperm.xlu0 %1341, %v1158_v62  }
 0x3a1   :  { %v1199_v32 = vpop.permute.xlu0 %1198 }
 0x3a2   :  { %1201 = vst [vmem:[%s2580_s3] sm:$0x1] %v1199_v32 }

</bundles_post_ra>
